<compile_context>
chip_gen: v7x
topology: tpu7x:2x2x1
jax: 0.10.0
libtpu: 0.0.40
codegen_flags: <defaults>
</compile_context>

<pallas_src>
import jax
import jax.numpy as jnp
from jax.experimental import pallas as pl
from jax.experimental.pallas import tpu as pltpu

NEG_SLOPE = 0.01          # torch.nn.LeakyReLU default negative_slope
N_FEAT = 496              # fixed by nn.Unflatten(1, (2, 248))
D_IN = N_FEAT + 2         # 498
D_PAD = 512               # padded feature width (multiple of 128)
TB_MAX = 1024             # max batch-tile rows per grid step


def _round_up(x, m):
    return (x + m - 1) // m * m


def _leaky_relu(x):
    # max(x, a*x) == LeakyReLU(a) for 0 < a < 1 — single VPU op.
    return jnp.maximum(x, NEG_SLOPE * x)


def fc_ff_v2_kernel(x_ref, c_ref, t_ref, b_ref, w_hbm, o_ref, wbuf, sem):
    # x_ref:  (TB, 496) f32 VMEM  — flattened x rows for this batch tile
    # c_ref:  (TB, 1)   f32 VMEM
    # t_ref:  (TB, 1)   f32 VMEM
    # b_ref:  (3, 1, 512) f32 VMEM — packed biases (constant block)
    # w_hbm:  (3, 512, 512) bf16 raw HBM ref — packed, pre-transposed weights
    # o_ref:  (TB, 496) f32 VMEM
    # wbuf:   (3, 512, 512) bf16 VMEM scratch (persists across grid steps)
    # sem:    (3,) DMA semaphores
    is_first = pl.program_id(0) == 0
    copies = [
        pltpu.make_async_copy(w_hbm.at[l], wbuf.at[l], sem.at[l]) for l in range(3)
    ]

    # Fetch the three weight slabs exactly once per call; slab 0 first since it
    # is needed first.  Later grid steps reuse the resident VMEM copy.
    @pl.when(is_first)
    def _start_weight_dma():
        for cp in copies:
            cp.start()

    x = x_ref[...].astype(jnp.bfloat16)           # (TB, 496)
    cf = c_ref[...].astype(jnp.float32)           # (TB, 1)
    tf = t_ref[...].astype(jnp.float32)           # (TB, 1)

    # ---- layer 1: Linear(498 -> 498) + LeakyReLU ---------------------------
    @pl.when(is_first)
    def _wait_w1():
        copies[0].wait()

    h = jnp.dot(x, wbuf[0, :N_FEAT, :], preferred_element_type=jnp.float32)
    w_ct = wbuf[0, N_FEAT:N_FEAT + 2, :].astype(jnp.float32)   # rows for c, t
    h = h + cf * w_ct[0:1, :] + tf * w_ct[1:2, :] + b_ref[0]
    h = _leaky_relu(h).astype(jnp.bfloat16)

    # ---- layer 2: Linear(498 -> 496) + LeakyReLU ---------------------------
    @pl.when(is_first)
    def _wait_w2():
        copies[1].wait()

    h = jnp.dot(h, wbuf[1], preferred_element_type=jnp.float32) + b_ref[1]
    h = _leaky_relu(h).astype(jnp.bfloat16)

    # ---- layer 3: Linear(496 -> 496) ---------------------------------------
    @pl.when(is_first)
    def _wait_w3():
        copies[2].wait()

    h = jnp.dot(h, wbuf[2], preferred_element_type=jnp.float32) + b_ref[2]
    o_ref[...] = h[:, :N_FEAT]


def fc_ff_v2_forward(x, c, t, params, *, tb_max=TB_MAX):
    """x: (B, 2, 248) f32; c, t: (B, 1) f32 -> (B, 2, 248) f32."""
    w_packed, b_packed = params
    B = x.shape[0]
    x_flat = x.reshape(B, N_FEAT)                      # contiguous, free reshape

    TB = min(tb_max, _round_up(B, 8))                  # >= 8 rows (full sublanes)
    B_pad = _round_up(B, TB)
    if B_pad != B:
        pad = B_pad - B
        x_flat = jnp.concatenate(
            [x_flat, jnp.zeros((pad, N_FEAT), x_flat.dtype)], axis=0)
        c = jnp.concatenate([c, jnp.zeros((pad, 1), c.dtype)], axis=0)
        t = jnp.concatenate([t, jnp.zeros((pad, 1), t.dtype)], axis=0)

    grid = (B_pad // TB,)

    out = pl.pallas_call(
        fc_ff_v2_kernel,
        out_shape=jax.ShapeDtypeStruct((B_pad, N_FEAT), jnp.float32),
        grid=grid,
        in_specs=[
            pl.BlockSpec((TB, N_FEAT), lambda i: (i, 0)),        # x tile
            pl.BlockSpec((TB, 1), lambda i: (i, 0)),             # c tile
            pl.BlockSpec((TB, 1), lambda i: (i, 0)),             # t tile
            pl.BlockSpec((3, 1, D_PAD), lambda i: (0, 0, 0)),    # packed biases
            pl.BlockSpec(memory_space=pl.ANY),                   # weights stay in HBM
        ],
        out_specs=pl.BlockSpec((TB, N_FEAT), lambda i: (i, 0)),
        scratch_shapes=[
            pltpu.VMEM((3, D_PAD, D_PAD), jnp.bfloat16),         # resident weights
            pltpu.SemaphoreType.DMA((3,)),
        ],
        compiler_params=pltpu.CompilerParams(
            # "arbitrary": sequential grid on one core — required so the
            # fetch-once weight DMA (program_id==0) covers every batch tile.
            dimension_semantics=("arbitrary",),
            vmem_limit_bytes=48 * 1024 * 1024,
        ),
    )(x_flat, c, t, b_packed, w_packed)

    # drop padded rows (no-op when B is a tile multiple), then Unflatten(1,(2,248))
    return out[:B].reshape(B, 2, N_FEAT // 2)


def init_params(key):
    """Torch nn.Linear-style init (U[-1/sqrt(fan_in), 1/sqrt(fan_in)]).
    Weights stored pre-transposed as (in, out), zero-padded to 512x512 and
    packed into (3,512,512) bf16; biases zero-padded, packed (3,1,512) f32.
    W1 rows: 0..495 = x features, 496 = c, 497 = t (matches torch cat order)."""
    ks = jax.random.split(key, 6)

    def uni(k, shape, fan_in):
        bound = 1.0 / jnp.sqrt(jnp.float32(fan_in))
        return jax.random.uniform(k, shape, jnp.float32, -bound, bound)

    w1 = uni(ks[0], (D_IN, D_IN), D_IN)
    b1 = uni(ks[1], (D_IN,), D_IN)
    w2 = uni(ks[2], (D_IN, N_FEAT), D_IN)
    b2 = uni(ks[3], (N_FEAT,), D_IN)
    w3 = uni(ks[4], (N_FEAT, N_FEAT), N_FEAT)
    b3 = uni(ks[5], (N_FEAT,), N_FEAT)

    def pad_w(w):
        z = jnp.zeros((D_PAD, D_PAD), jnp.float32)
        return z.at[: w.shape[0], : w.shape[1]].set(w)

    def pad_b(b):
        z = jnp.zeros((D_PAD,), jnp.float32)
        return z.at[: b.shape[0]].set(b)

    w_packed = jnp.stack([pad_w(w1), pad_w(w2), pad_w(w3)]).astype(jnp.bfloat16)
    b_packed = jnp.stack([pad_b(b1), pad_b(b2), pad_b(b3)])[:, None, :]
    return (w_packed, b_packed)


def reference_forward(x, c, t, params):
    """Pure-JAX reference with identical (bf16-weight, f32-accumulate) math."""
    w, b = params
    B = x.shape[0]
    xb = x.reshape(B, N_FEAT).astype(jnp.bfloat16)
    h = jnp.dot(xb, w[0, :N_FEAT, :], preferred_element_type=jnp.float32)
    h = h + c * w[0, N_FEAT, :].astype(jnp.float32)
    h = h + t * w[0, N_FEAT + 1, :].astype(jnp.float32)
    h = _leaky_relu(h + b[0])
    h = jnp.dot(h.astype(jnp.bfloat16), w[1], preferred_element_type=jnp.float32) + b[1]
    h = _leaky_relu(h)
    h = jnp.dot(h.astype(jnp.bfloat16), w[2], preferred_element_type=jnp.float32) + b[2]
    return h[:, :N_FEAT].reshape(B, 2, N_FEAT // 2)


if __name__ == "__main__":
    key = jax.random.PRNGKey(0)
    k_x, k_c, k_t, k_p = jax.random.split(key, 4)
    params = init_params(k_p)

    # Small-shape check (B=2; padded internally to one 8-row batch tile).
    B = 2
    x = jax.random.normal(k_x, (B, 2, 248), jnp.float32)
    c = jax.random.normal(k_c, (B, 1), jnp.float32)
    t = jax.random.normal(k_t, (B, 1), jnp.float32)
    out = jax.block_until_ready(fc_ff_v2_forward(x, c, t, params))
    ref = jax.block_until_ready(reference_forward(x, c, t, params))
    assert out.shape == (B, 2, 248), out.shape
    assert jnp.allclose(out, ref, atol=2e-3, rtol=2e-3), "mismatch vs JAX reference"

    # Multi-tile check: exercises the batch grid + fetch-once weight path
    # (B=130, tile=64 -> 3 grid steps, padded rows discarded).
    B2 = 130
    x2 = jax.random.normal(k_x, (B2, 2, 248), jnp.float32)
    c2 = jax.random.normal(k_c, (B2, 1), jnp.float32)
    t2 = jax.random.normal(k_t, (B2, 1), jnp.float32)
    out2 = jax.block_until_ready(fc_ff_v2_forward(x2, c2, t2, params, tb_max=64))
    ref2 = jax.block_until_ready(reference_forward(x2, c2, t2, params))
    assert out2.shape == (B2, 2, 248), out2.shape
    assert jnp.allclose(out2, ref2, atol=2e-3, rtol=2e-3), "mismatch (multi-tile)"

    print("KERNEL_OK")
</pallas_src>

<mosaic_0001>
module attributes {stable_mosaic.version = 11 : i64} {
  func.func @fc_ff_v2_kernel(%arg0: i32, %arg1: memref<8x496xf32, #tpu.memory_space<vmem>>, %arg2: memref<8x1xf32, #tpu.memory_space<vmem>>, %arg3: memref<8x1xf32, #tpu.memory_space<vmem>>, %arg4: memref<3x1x512xf32, #tpu.memory_space<vmem>>, %arg5: memref<3x512x512xbf16, #tpu.memory_space<any>>, %arg6: memref<8x496xf32, #tpu.memory_space<vmem>>, %arg7: memref<3x512x512xbf16, #tpu.memory_space<vmem>>, %arg8: memref<3x!tpu.dma_semaphore, #tpu.memory_space<semaphore_mem>>) attributes {dimension_semantics = [#tpu.dimension_semantics<arbitrary>], iteration_bounds = array<i64: 1>, scalar_prefetch = 0 : i64, scratch_operands = 2 : i64, tpu.core_type = #tpu.core_type<tc>, window_params = [{transform_indices = @transform_0, window_bounds = array<i64: 8, 496>}, {transform_indices = @transform_1, window_bounds = array<i64: 8, 1>}, {transform_indices = @transform_2, window_bounds = array<i64: 8, 1>}, {pipeline_mode = #tpu.pipeline_mode<synchronous>, transform_indices = @transform_3, window_bounds = array<i64: 3, 1, 512>}, {}, {transform_indices = @transform_5, window_bounds = array<i64: 8, 496>}]} {
    %c0_i32 = arith.constant 0 : i32
    %0 = arith.cmpi eq, %arg0, %c0_i32 : i32
    %1 = arith.extui %0 : i1 to i32
    %c0_i32_0 = arith.constant 0 : i32
    %c0_i32_1 = arith.constant 0 : i32
    %c0_i32_2 = arith.constant 0 : i32
    %c1_i32 = arith.constant 1 : i32
    %c1_i32_3 = arith.constant 1 : i32
    %c1_i32_4 = arith.constant 1 : i32
    %c2_i32 = arith.constant 2 : i32
    %c2_i32_5 = arith.constant 2 : i32
    %c2_i32_6 = arith.constant 2 : i32
    %c0_i32_7 = arith.constant 0 : i32
    %2 = arith.cmpi ne, %1, %c0_i32_7 : i32
    scf.if %2 {
      %c0_i32_49 = arith.constant 0 : i32
      %c0_i32_50 = arith.constant 0 : i32
      %57 = tpu.memref_slice %arg5[%c0_i32_0, %c0_i32_49, %c0_i32_50] : memref<3x512x512xbf16, #tpu.memory_space<any>> -> memref<1x512x512xbf16, #tpu.memory_space<any>>
      %58 = tpu.memref_squeeze %57 : memref<1x512x512xbf16, #tpu.memory_space<any>> -> memref<512x512xbf16, #tpu.memory_space<any>>
      %c0_i32_51 = arith.constant 0 : i32
      %c0_i32_52 = arith.constant 0 : i32
      %59 = tpu.memref_slice %arg7[%c0_i32_1, %c0_i32_51, %c0_i32_52] : memref<3x512x512xbf16, #tpu.memory_space<vmem>> -> memref<1x512x512xbf16, #tpu.memory_space<vmem>>
      %60 = tpu.memref_squeeze %59 : memref<1x512x512xbf16, #tpu.memory_space<vmem>> -> memref<512x512xbf16, #tpu.memory_space<vmem>>
      %61 = tpu.memref_slice %arg8[%c0_i32_2] : memref<3x!tpu.dma_semaphore, #tpu.memory_space<semaphore_mem>> -> memref<1x!tpu.dma_semaphore, #tpu.memory_space<semaphore_mem>>
      %62 = tpu.memref_squeeze %61 : memref<1x!tpu.dma_semaphore, #tpu.memory_space<semaphore_mem>> -> memref<!tpu.dma_semaphore, #tpu.memory_space<semaphore_mem>>
      tpu.enqueue_dma source(%58 : memref<512x512xbf16, #tpu.memory_space<any>>) target(%60 : memref<512x512xbf16, #tpu.memory_space<vmem>>) target_semaphore(%62 : memref<!tpu.dma_semaphore, #tpu.memory_space<semaphore_mem>>)
      %c0_i32_53 = arith.constant 0 : i32
      %c0_i32_54 = arith.constant 0 : i32
      %63 = tpu.memref_slice %arg5[%c1_i32, %c0_i32_53, %c0_i32_54] : memref<3x512x512xbf16, #tpu.memory_space<any>> -> memref<1x512x512xbf16, #tpu.memory_space<any>>
      %64 = tpu.memref_squeeze %63 : memref<1x512x512xbf16, #tpu.memory_space<any>> -> memref<512x512xbf16, #tpu.memory_space<any>>
      %c0_i32_55 = arith.constant 0 : i32
      %c0_i32_56 = arith.constant 0 : i32
      %65 = tpu.memref_slice %arg7[%c1_i32_3, %c0_i32_55, %c0_i32_56] : memref<3x512x512xbf16, #tpu.memory_space<vmem>> -> memref<1x512x512xbf16, #tpu.memory_space<vmem>>
      %66 = tpu.memref_squeeze %65 : memref<1x512x512xbf16, #tpu.memory_space<vmem>> -> memref<512x512xbf16, #tpu.memory_space<vmem>>
      %67 = tpu.memref_slice %arg8[%c1_i32_4] : memref<3x!tpu.dma_semaphore, #tpu.memory_space<semaphore_mem>> -> memref<1x!tpu.dma_semaphore, #tpu.memory_space<semaphore_mem>>
      %68 = tpu.memref_squeeze %67 : memref<1x!tpu.dma_semaphore, #tpu.memory_space<semaphore_mem>> -> memref<!tpu.dma_semaphore, #tpu.memory_space<semaphore_mem>>
      tpu.enqueue_dma source(%64 : memref<512x512xbf16, #tpu.memory_space<any>>) target(%66 : memref<512x512xbf16, #tpu.memory_space<vmem>>) target_semaphore(%68 : memref<!tpu.dma_semaphore, #tpu.memory_space<semaphore_mem>>)
      %c0_i32_57 = arith.constant 0 : i32
      %c0_i32_58 = arith.constant 0 : i32
      %69 = tpu.memref_slice %arg5[%c2_i32, %c0_i32_57, %c0_i32_58] : memref<3x512x512xbf16, #tpu.memory_space<any>> -> memref<1x512x512xbf16, #tpu.memory_space<any>>
      %70 = tpu.memref_squeeze %69 : memref<1x512x512xbf16, #tpu.memory_space<any>> -> memref<512x512xbf16, #tpu.memory_space<any>>
      %c0_i32_59 = arith.constant 0 : i32
      %c0_i32_60 = arith.constant 0 : i32
      %71 = tpu.memref_slice %arg7[%c2_i32_5, %c0_i32_59, %c0_i32_60] : memref<3x512x512xbf16, #tpu.memory_space<vmem>> -> memref<1x512x512xbf16, #tpu.memory_space<vmem>>
      %72 = tpu.memref_squeeze %71 : memref<1x512x512xbf16, #tpu.memory_space<vmem>> -> memref<512x512xbf16, #tpu.memory_space<vmem>>
      %73 = tpu.memref_slice %arg8[%c2_i32_6] : memref<3x!tpu.dma_semaphore, #tpu.memory_space<semaphore_mem>> -> memref<1x!tpu.dma_semaphore, #tpu.memory_space<semaphore_mem>>
      %74 = tpu.memref_squeeze %73 : memref<1x!tpu.dma_semaphore, #tpu.memory_space<semaphore_mem>> -> memref<!tpu.dma_semaphore, #tpu.memory_space<semaphore_mem>>
      tpu.enqueue_dma source(%70 : memref<512x512xbf16, #tpu.memory_space<any>>) target(%72 : memref<512x512xbf16, #tpu.memory_space<vmem>>) target_semaphore(%74 : memref<!tpu.dma_semaphore, #tpu.memory_space<semaphore_mem>>)
    } else {
    }
    %c0 = arith.constant 0 : index
    %c0_8 = arith.constant 0 : index
    %3 = vector.load %arg1[%c0, %c0_8] : memref<8x496xf32, #tpu.memory_space<vmem>>, vector<8x496xf32>
    %4 = arith.truncf %3 : vector<8x496xf32> to vector<8x496xbf16>
    %c0_9 = arith.constant 0 : index
    %c0_10 = arith.constant 0 : index
    %5 = vector.load %arg2[%c0_9, %c0_10] : memref<8x1xf32, #tpu.memory_space<vmem>>, vector<8x1xf32>
    %c0_11 = arith.constant 0 : index
    %c0_12 = arith.constant 0 : index
    %6 = vector.load %arg3[%c0_11, %c0_12] : memref<8x1xf32, #tpu.memory_space<vmem>>, vector<8x1xf32>
    %7 = arith.extui %0 : i1 to i32
    %c0_i32_13 = arith.constant 0 : i32
    %c0_i32_14 = arith.constant 0 : i32
    %c0_i32_15 = arith.constant 0 : i32
    %c0_i32_16 = arith.constant 0 : i32
    %8 = arith.cmpi ne, %7, %c0_i32_16 : i32
    scf.if %8 {
      %c0_i32_49 = arith.constant 0 : i32
      %c0_i32_50 = arith.constant 0 : i32
      %57 = tpu.memref_slice %arg5[%c0_i32_13, %c0_i32_49, %c0_i32_50] : memref<3x512x512xbf16, #tpu.memory_space<any>> -> memref<1x512x512xbf16, #tpu.memory_space<any>>
      %58 = tpu.memref_squeeze %57 : memref<1x512x512xbf16, #tpu.memory_space<any>> -> memref<512x512xbf16, #tpu.memory_space<any>>
      %c0_i32_51 = arith.constant 0 : i32
      %c0_i32_52 = arith.constant 0 : i32
      %59 = tpu.memref_slice %arg7[%c0_i32_14, %c0_i32_51, %c0_i32_52] : memref<3x512x512xbf16, #tpu.memory_space<vmem>> -> memref<1x512x512xbf16, #tpu.memory_space<vmem>>
      %60 = tpu.memref_squeeze %59 : memref<1x512x512xbf16, #tpu.memory_space<vmem>> -> memref<512x512xbf16, #tpu.memory_space<vmem>>
      %61 = tpu.memref_slice %arg8[%c0_i32_15] : memref<3x!tpu.dma_semaphore, #tpu.memory_space<semaphore_mem>> -> memref<1x!tpu.dma_semaphore, #tpu.memory_space<semaphore_mem>>
      %62 = tpu.memref_squeeze %61 : memref<1x!tpu.dma_semaphore, #tpu.memory_space<semaphore_mem>> -> memref<!tpu.dma_semaphore, #tpu.memory_space<semaphore_mem>>
      tpu.wait_dma2 semaphore(%62 : memref<!tpu.dma_semaphore, #tpu.memory_space<semaphore_mem>>) src(%58 : memref<512x512xbf16, #tpu.memory_space<any>>) dst(%60 : memref<512x512xbf16, #tpu.memory_space<vmem>>)
    } else {
    }
    %c0_17 = arith.constant 0 : index
    %c0_18 = arith.constant 0 : index
    %c0_19 = arith.constant 0 : index
    %9 = vector.load %arg7[%c0_17, %c0_18, %c0_19] : memref<3x512x512xbf16, #tpu.memory_space<vmem>>, vector<1x496x512xbf16>
    %10 = vector.shape_cast %9 : vector<1x496x512xbf16> to vector<496x512xbf16>
    %cst = arith.constant dense<0.000000e+00> : vector<8x512xf32>
    %11 = tpu.matmul %4, %10, %cst {dimension_numbers = #tpu.dot_dimension_numbers<[1], [0], [0], [1], [0, 0, 1, 1], [], []>} : vector<8x496xbf16>, vector<496x512xbf16>, vector<8x512xf32> -> vector<8x512xf32>
    %c0_20 = arith.constant 0 : index
    %c496 = arith.constant 496 : index
    %c0_21 = arith.constant 0 : index
    %12 = vector.load %arg7[%c0_20, %c496, %c0_21] : memref<3x512x512xbf16, #tpu.memory_space<vmem>>, vector<1x2x512xbf16>
    %13 = vector.shape_cast %12 : vector<1x2x512xbf16> to vector<2x512xbf16>
    %14 = arith.extf %13 : vector<2x512xbf16> to vector<2x512xf32>
    %15 = vector.extract_strided_slice %14 {offsets = [0, 0], sizes = [1, 512], strides = [1, 1]} : vector<2x512xf32> to vector<1x512xf32>
    %16 = vector.broadcast %5 : vector<8x1xf32> to vector<8x512xf32>
    %17 = vector.broadcast %15 : vector<1x512xf32> to vector<8x512xf32>
    %18 = arith.mulf %16, %17 : vector<8x512xf32>
    %19 = arith.addf %11, %18 : vector<8x512xf32>
    %20 = vector.extract_strided_slice %14 {offsets = [1, 0], sizes = [1, 512], strides = [1, 1]} : vector<2x512xf32> to vector<1x512xf32>
    %21 = vector.broadcast %6 : vector<8x1xf32> to vector<8x512xf32>
    %22 = vector.broadcast %20 : vector<1x512xf32> to vector<8x512xf32>
    %23 = arith.mulf %21, %22 : vector<8x512xf32>
    %24 = arith.addf %19, %23 : vector<8x512xf32>
    %c0_22 = arith.constant 0 : index
    %c0_23 = arith.constant 0 : index
    %c0_24 = arith.constant 0 : index
    %25 = vector.load %arg4[%c0_22, %c0_23, %c0_24] : memref<3x1x512xf32, #tpu.memory_space<vmem>>, vector<1x1x512xf32>
    %26 = vector.shape_cast %25 : vector<1x1x512xf32> to vector<1x512xf32>
    %27 = vector.broadcast %26 : vector<1x512xf32> to vector<8x512xf32>
    %28 = arith.addf %24, %27 : vector<8x512xf32>
    %cst_25 = arith.constant 0.00999999977 : f32
    %29 = vector.broadcast %cst_25 : f32 to vector<8x512xf32>
    %30 = arith.mulf %29, %28 : vector<8x512xf32>
    %31 = arith.maximumf %28, %30 : vector<8x512xf32>
    %32 = arith.truncf %31 : vector<8x512xf32> to vector<8x512xbf16>
    %33 = arith.extui %0 : i1 to i32
    %c1_i32_26 = arith.constant 1 : i32
    %c1_i32_27 = arith.constant 1 : i32
    %c1_i32_28 = arith.constant 1 : i32
    %c0_i32_29 = arith.constant 0 : i32
    %34 = arith.cmpi ne, %33, %c0_i32_29 : i32
    scf.if %34 {
      %c0_i32_49 = arith.constant 0 : i32
      %c0_i32_50 = arith.constant 0 : i32
      %57 = tpu.memref_slice %arg5[%c1_i32_26, %c0_i32_49, %c0_i32_50] : memref<3x512x512xbf16, #tpu.memory_space<any>> -> memref<1x512x512xbf16, #tpu.memory_space<any>>
      %58 = tpu.memref_squeeze %57 : memref<1x512x512xbf16, #tpu.memory_space<any>> -> memref<512x512xbf16, #tpu.memory_space<any>>
      %c0_i32_51 = arith.constant 0 : i32
      %c0_i32_52 = arith.constant 0 : i32
      %59 = tpu.memref_slice %arg7[%c1_i32_27, %c0_i32_51, %c0_i32_52] : memref<3x512x512xbf16, #tpu.memory_space<vmem>> -> memref<1x512x512xbf16, #tpu.memory_space<vmem>>
      %60 = tpu.memref_squeeze %59 : memref<1x512x512xbf16, #tpu.memory_space<vmem>> -> memref<512x512xbf16, #tpu.memory_space<vmem>>
      %61 = tpu.memref_slice %arg8[%c1_i32_28] : memref<3x!tpu.dma_semaphore, #tpu.memory_space<semaphore_mem>> -> memref<1x!tpu.dma_semaphore, #tpu.memory_space<semaphore_mem>>
      %62 = tpu.memref_squeeze %61 : memref<1x!tpu.dma_semaphore, #tpu.memory_space<semaphore_mem>> -> memref<!tpu.dma_semaphore, #tpu.memory_space<semaphore_mem>>
      tpu.wait_dma2 semaphore(%62 : memref<!tpu.dma_semaphore, #tpu.memory_space<semaphore_mem>>) src(%58 : memref<512x512xbf16, #tpu.memory_space<any>>) dst(%60 : memref<512x512xbf16, #tpu.memory_space<vmem>>)
    } else {
    }
    %c1 = arith.constant 1 : index
    %c0_30 = arith.constant 0 : index
    %c0_31 = arith.constant 0 : index
    %35 = vector.load %arg7[%c1, %c0_30, %c0_31] : memref<3x512x512xbf16, #tpu.memory_space<vmem>>, vector<1x512x512xbf16>
    %36 = vector.shape_cast %35 : vector<1x512x512xbf16> to vector<512x512xbf16>
    %cst_32 = arith.constant dense<0.000000e+00> : vector<8x512xf32>
    %37 = tpu.matmul %32, %36, %cst_32 {dimension_numbers = #tpu.dot_dimension_numbers<[1], [0], [0], [1], [0, 0, 1, 1], [], []>} : vector<8x512xbf16>, vector<512x512xbf16>, vector<8x512xf32> -> vector<8x512xf32>
    %c1_33 = arith.constant 1 : index
    %c0_34 = arith.constant 0 : index
    %c0_35 = arith.constant 0 : index
    %38 = vector.load %arg4[%c1_33, %c0_34, %c0_35] : memref<3x1x512xf32, #tpu.memory_space<vmem>>, vector<1x1x512xf32>
    %39 = vector.shape_cast %38 : vector<1x1x512xf32> to vector<1x512xf32>
    %40 = vector.broadcast %39 : vector<1x512xf32> to vector<8x512xf32>
    %41 = arith.addf %37, %40 : vector<8x512xf32>
    %cst_36 = arith.constant 0.00999999977 : f32
    %42 = vector.broadcast %cst_36 : f32 to vector<8x512xf32>
    %43 = arith.mulf %42, %41 : vector<8x512xf32>
    %44 = arith.maximumf %41, %43 : vector<8x512xf32>
    %45 = arith.truncf %44 : vector<8x512xf32> to vector<8x512xbf16>
    %46 = arith.extui %0 : i1 to i32
    %c2_i32_37 = arith.constant 2 : i32
    %c2_i32_38 = arith.constant 2 : i32
    %c2_i32_39 = arith.constant 2 : i32
    %c0_i32_40 = arith.constant 0 : i32
    %47 = arith.cmpi ne, %46, %c0_i32_40 : i32
    scf.if %47 {
      %c0_i32_49 = arith.constant 0 : i32
      %c0_i32_50 = arith.constant 0 : i32
      %57 = tpu.memref_slice %arg5[%c2_i32_37, %c0_i32_49, %c0_i32_50] : memref<3x512x512xbf16, #tpu.memory_space<any>> -> memref<1x512x512xbf16, #tpu.memory_space<any>>
      %58 = tpu.memref_squeeze %57 : memref<1x512x512xbf16, #tpu.memory_space<any>> -> memref<512x512xbf16, #tpu.memory_space<any>>
      %c0_i32_51 = arith.constant 0 : i32
      %c0_i32_52 = arith.constant 0 : i32
      %59 = tpu.memref_slice %arg7[%c2_i32_38, %c0_i32_51, %c0_i32_52] : memref<3x512x512xbf16, #tpu.memory_space<vmem>> -> memref<1x512x512xbf16, #tpu.memory_space<vmem>>
      %60 = tpu.memref_squeeze %59 : memref<1x512x512xbf16, #tpu.memory_space<vmem>> -> memref<512x512xbf16, #tpu.memory_space<vmem>>
      %61 = tpu.memref_slice %arg8[%c2_i32_39] : memref<3x!tpu.dma_semaphore, #tpu.memory_space<semaphore_mem>> -> memref<1x!tpu.dma_semaphore, #tpu.memory_space<semaphore_mem>>
      %62 = tpu.memref_squeeze %61 : memref<1x!tpu.dma_semaphore, #tpu.memory_space<semaphore_mem>> -> memref<!tpu.dma_semaphore, #tpu.memory_space<semaphore_mem>>
      tpu.wait_dma2 semaphore(%62 : memref<!tpu.dma_semaphore, #tpu.memory_space<semaphore_mem>>) src(%58 : memref<512x512xbf16, #tpu.memory_space<any>>) dst(%60 : memref<512x512xbf16, #tpu.memory_space<vmem>>)
    } else {
    }
    %c2 = arith.constant 2 : index
    %c0_41 = arith.constant 0 : index
    %c0_42 = arith.constant 0 : index
    %48 = vector.load %arg7[%c2, %c0_41, %c0_42] : memref<3x512x512xbf16, #tpu.memory_space<vmem>>, vector<1x512x512xbf16>
    %49 = vector.shape_cast %48 : vector<1x512x512xbf16> to vector<512x512xbf16>
    %cst_43 = arith.constant dense<0.000000e+00> : vector<8x512xf32>
    %50 = tpu.matmul %45, %49, %cst_43 {dimension_numbers = #tpu.dot_dimension_numbers<[1], [0], [0], [1], [0, 0, 1, 1], [], []>} : vector<8x512xbf16>, vector<512x512xbf16>, vector<8x512xf32> -> vector<8x512xf32>
    %c2_44 = arith.constant 2 : index
    %c0_45 = arith.constant 0 : index
    %c0_46 = arith.constant 0 : index
    %51 = vector.load %arg4[%c2_44, %c0_45, %c0_46] : memref<3x1x512xf32, #tpu.memory_space<vmem>>, vector<1x1x512xf32>
    %52 = vector.shape_cast %51 : vector<1x1x512xf32> to vector<1x512xf32>
    %53 = vector.broadcast %52 : vector<1x512xf32> to vector<8x512xf32>
    %54 = arith.addf %50, %53 : vector<8x512xf32>
    %55 = vector.extract_strided_slice %54 {offsets = [0, 0], sizes = [8, 496], strides = [1, 1]} : vector<8x512xf32> to vector<8x496xf32>
    %c0_47 = arith.constant 0 : index
    %c0_48 = arith.constant 0 : index
    %56 = vector.load %arg6[%c0_47, %c0_48] : memref<8x496xf32, #tpu.memory_space<vmem>>, vector<8x496xf32>
    tpu.vector_store %arg6[%c0_47, %c0_48], %55 {strides = array<i32>} : memref<8x496xf32, #tpu.memory_space<vmem>>, vector<8x496xf32>,
    return
  }
  func.func @transform_0(%arg0: i32) -> (i32, i32) {
    %c0_i32 = arith.constant 0 : i32
    %c0_i32_0 = arith.constant 0 : i32
    return %arg0, %c0_i32 : i32, i32
  }
  func.func @transform_1(%arg0: i32) -> (i32, i32) {
    %c0_i32 = arith.constant 0 : i32
    %c0_i32_0 = arith.constant 0 : i32
    return %arg0, %c0_i32 : i32, i32
  }
  func.func @transform_2(%arg0: i32) -> (i32, i32) {
    %c0_i32 = arith.constant 0 : i32
    %c0_i32_0 = arith.constant 0 : i32
    return %arg0, %c0_i32 : i32, i32
  }
  func.func @transform_3(%arg0: i32) -> (i32, i32, i32) {
    %c0_i32 = arith.constant 0 : i32
    %c0_i32_0 = arith.constant 0 : i32
    %c0_i32_1 = arith.constant 0 : i32
    %c0_i32_2 = arith.constant 0 : i32
    return %c0_i32, %c0_i32_0, %c0_i32_1 : i32, i32, i32
  }
  func.func @transform_5(%arg0: i32) -> (i32, i32) {
    %c0_i32 = arith.constant 0 : i32
    %c0_i32_0 = arith.constant 0 : i32
    return %arg0, %c0_i32 : i32, i32
  }
}

</mosaic_0001>

<bundles_post_ra>
// kernel: tpu_custom_call.1
= control target key start
LH: loop header
LB: loop body
LE: loop exit
PB: predicated region body
PF: predicated region fallthrough
CT: control target
= control target key end

     0   :  { %10 = vsyncpa [#allocation5], 0  ;;  %s1615_s0 = inlined_call_operand.hbm [shape: f32[8,496], index: 0, kind: input, shape index: {}]   ;;  %s1616_s1 = inlined_call_operand.vmem [shape: f32[8,1], index: 1, kind: input, shape index: {}]   ;;  %s1617_s2 = inlined_call_operand.vmem [shape: f32[8,1], index: 2, kind: input, shape index: {}]   ;;  %s1618_s3 = inlined_call_operand.hbm [shape: f32[3,1,512], index: 3, kind: input, shape index: {}]   ;;  %s1619_s4 = inlined_call_operand.hbm [shape: bf16[3,512,512], index: 4, kind: input, shape index: {}]   ;;  %s1620_s5 = inlined_call_operand.hbm [shape: f32[8,496], index: 5, kind: output, shape index: {}]  }
   0x1   :  { %11 = vsyncpa [#allocation8], 0 }
   0x2   :  { %12 = vsyncpa [#allocation6], 0  ;;  %s1403_s18 = smov [#allocation4]   ;;  %s1404_s20 = smov [#allocation7]  }
   0x3   :  { %s19_s19 = sshll.u32 %s1403_s18, 4  ;;  %s32_s21 = sshll.u32 %s1404_s20, 4  ;;  %s20_s19 = int_to_ptr.vmem [resolvable:$true] %s19_s19  ;;  %s1454_s21 = int_to_ptr.vmem [resolvable:$true] %s32_s21 }
   0x4   :  { %s1325_s24 = scalar_lea.hbm %s1615_s0, 512 }
   0x5   :  { %p1326_p0 = scmp.ne.s32.totalorder %s1615_s0, %s1325_s24  ;;  %p1329_p1 = scmp.lt.u32.totalorder %s1325_s24, %s1615_s0 }
   0x7   :  { %p1331_p2 = pnand %p1329_p1, %p1326_p0 }
   0x9   :  { %1334 = shalt.err (!%p1331_p2)
}
   0xa   :  { %s1335_s29 = scalar_lea.vmem %s20_s19, 512  ;;  %p1340_p4 = scmp.lt.s32.totalorder %s20_s19, %s20_s19 }
   0xb   :  { %p1336_p3 = scmp.ne.s32.totalorder %s20_s19, %s1335_s29  ;;  %p1341_p5 = scmp.lt.s32.totalorder %s1335_s29, %s1335_s29 }
   0xd   :  { %p1342_p6 = por %p1341_p5, %p1340_p4 }
   0xf   :  { %p1343_p7 = pnand %p1342_p6, %p1336_p3 }
  0x11   :  { %1346 = shalt.err (!%p1343_p7)
}
  0x12   :  { %22 = dma.hbm_to_vmem [thread:$0]  %s1615_s0, 512, %s20_s19, [#allocation5]  }
  0x13   :  { %s1347_s9 = scalar_lea.hbm %s1618_s3, 192 }
  0x14   :  { %p1348_p8 = scmp.ne.s32.totalorder %s1618_s3, %s1347_s9  ;;  %p1351_p9 = scmp.lt.u32.totalorder %s1347_s9, %s1618_s3 }
  0x16   :  { %p1353_p10 = pnand %p1351_p9, %p1348_p8 }
  0x18   :  { %1356 = shalt.err (!%p1353_p10)
}
  0x19   :  { %s1357_s14 = scalar_lea.vmem %s1454_s21, 192  ;;  %p1362_p12 = scmp.lt.s32.totalorder %s1454_s21, %s1454_s21 }
  0x1a   :  { %p1358_p11 = scmp.ne.s32.totalorder %s1454_s21, %s1357_s14  ;;  %p1363_p13 = scmp.lt.s32.totalorder %s1357_s14, %s1357_s14 }
  0x1c   :  { %p1364_p0 = por %p1363_p13, %p1362_p12 }
  0x1e   :  { %p1365_p1 = pnand %p1364_p0, %p1358_p11 }
  0x20   :  { %1368 = shalt.err (!%p1365_p1)
}
  0x21   :  { %s1405_s0 = smov 64   ;;  %s1406_s15 = smov 4  }
  0x22   :  { %38 = dma.hbm_to_vmem [thread:$0]  %s1618_s3, 192, %s1454_s21, [#allocation8], %s1405_s0, %s1405_s0, %s1406_s15  }
  0x23   :  { %1391 = dma.done.wait [#allocation5], 512  }
  0x24   :  { %1392 = vsyncadd [#allocation5], 4294966784 }
  0x25   :  { %1393 = dma.done.wait [#allocation8], 192  }
  0x26   :  { %1394 = vsyncadd [#allocation8], 4294967104 }
  0x27   :  { %s54_s18 = sld [smem:[#allocation0]]   ;;  %s1407_s19 = smov [#allocation2]  }
  0x28   :  { %s62_s20 = sshll.u32 %s1407_s19, 4  ;;  %s1408_s22 = smov 512   ;;  %s63_s20 = int_to_ptr.vmem [resolvable:$true] %s62_s20 }
  0x29   :  { %66 = sst [smem:[#allocation11]] %s1408_s22  ;;  %s1409_s23 = smov 4  }
  0x2a   :  { %68 = sst [smem:[#allocation11 + $0x1]] %s1408_s22  ;;  %s1410_s24 = smov 64  }
  0x2b   :  { %70 = sst [smem:[#allocation11 + $0x2]] %s1409_s23  ;;  %s1411_s21 = smov 128  }
  0x2c   :  { %72 = sst [smem:[#allocation11 + $0x3]] %s1410_s24  ;;  %s1412_s26 = smov 2  }
  0x2d   :  { %s1268_s3 = sshll.u32 %s54_s18, 26  ;;  %74 = sst [smem:[#allocation11 + $0x4]] %s1411_s21 }
  0x2e   :  { %s1490_s25 = sadd.s32 134217728, %s1268_s3  ;;  %76 = sst [smem:[#allocation11 + $0x5]] %s1412_s26 }
  0x2f   :  { %s1413_s27 = smov 256   ;;  %80 = sst [smem:[#allocation11 + $0x7]] %s1410_s24 }
  0x30   :  { %78 = sst [smem:[#allocation11 + $0x6]] %s1413_s27  ;;  %s1414_s28 = smov [#allocation3]  }
  0x31   :  { %82 = sst [smem:[#allocation11 + $0x8]] %s1409_s23  ;;  %s1415_s29 = smov [#allocation10]  }
  0x32   :  { %84 = dma.general %s1619_s4, 16384, %s63_s20, %s1414_s28, %s1415_s29, [#allocation11], %s1490_s25, 0  }
  0x33   :  { %103 = sst [smem:[#allocation13]] %s1408_s22  ;;  %s1416_s7 = smov [#allocation2 + $0x400]  }
  0x34   :  { %105 = sst [smem:[#allocation13 + $0x1]] %s1408_s22  ;;  %s99_s8 = sshll.u32 %s1416_s7, 4  ;;  %s100_s8 = int_to_ptr.vmem [resolvable:$true] %s99_s8 }
  0x35   :  { %107 = sst [smem:[#allocation13 + $0x2]] %s1409_s23  ;;  %s85_s11 = scalar_lea.hbm %s1619_s4, 16384 }
  0x36   :  { %109 = sst [smem:[#allocation13 + $0x3]] %s1410_s24  ;;  %s1417_s12 = smov [#allocation3 + $0x1]  }
  0x37   :  { %111 = sst [smem:[#allocation13 + $0x4]] %s1411_s21  ;;  %s1418_s13 = smov [#allocation12]  }
  0x38   :  { %113 = sst [smem:[#allocation13 + $0x5]] %s1412_s26  ;;  %s1419_s14 = smov [#allocation2 + $0x800]  }
  0x39   :  { %115 = sst [smem:[#allocation13 + $0x6]] %s1413_s27  ;;  %s136_s0 = sshll.u32 %s1419_s14, 4  ;;  %s137_s0 = int_to_ptr.vmem [resolvable:$true] %s136_s0 }
  0x3a   :  { %117 = sst [smem:[#allocation13 + $0x7]] %s1410_s24  ;;  %s122_s17 = scalar_lea.hbm %s1619_s4, 32768 }
  0x3b   :  { %119 = sst [smem:[#allocation13 + $0x8]] %s1409_s23  ;;  %s1420_s18 = smov [#allocation3 + $0x2]  }
  0x3c   :  { %121 = dma.general %s85_s11, 16384, %s100_s8, %s1417_s12, %s1418_s13, [#allocation13], %s1490_s25, 0  }
  0x3d   :  { %140 = sst [smem:[#allocation15]] %s1408_s22  ;;  %s1421_s19 = smov [#allocation14]  }
  0x3e   :  { %142 = sst [smem:[#allocation15 + $0x1]] %s1408_s22 }
  0x3f   :  { %144 = sst [smem:[#allocation15 + $0x2]] %s1409_s23 }
  0x40   :  { %146 = sst [smem:[#allocation15 + $0x3]] %s1410_s24 }
  0x41   :  { %148 = sst [smem:[#allocation15 + $0x4]] %s1411_s21 }
  0x42   :  { %150 = sst [smem:[#allocation15 + $0x5]] %s1412_s26 }
  0x43   :  { %152 = sst [smem:[#allocation15 + $0x6]] %s1413_s27 }
  0x44   :  { %154 = sst [smem:[#allocation15 + $0x7]] %s1410_s24 }
  0x45   :  { %156 = sst [smem:[#allocation15 + $0x8]] %s1409_s23 }
  0x46   :  { %158 = dma.general %s122_s17, 16384, %s137_s0, %s1420_s18, %s1421_s19, [#allocation15], %s1490_s25, 0  }
  0x47   :  { %v159_v0 = vld [vmem:[#allocation4] sm:$0xff]  ;;  %v160_v1 = vld [vmem:[#allocation4 + $0x8] sm:$0xff]  ;;  %v161_v2 = vld [vmem:[#allocation4 + $0x10] sm:$0xff] }
  0x48   :  { %v162_v3 = vld [vmem:[#allocation4 + $0x18] sm:$0xff]  ;;  %v1526_v4 = vpack.c.bf16 %v159_v0, %v159_v0  ;;  %v1528_v5 = vpack.c.bf16 %v160_v1, %v160_v1  ;;  %v1530_v6 = vpack.c.bf16 %v161_v2, %v161_v2  ;;  %v167_v7 = vld [vmem:[%s1616_s1] sm:$0xff] }
  0x49   :  { %v168_v8 = vld [vmem:[%s1617_s2] sm:$0xff]  ;;  %v1538_v9 = vpack.c.bf16 %v162_v3, %v162_v3 }
  0x4a   :  { %1395 = dma.done.wait [#allocation3], 16384 }
  0x4b   :  { %1396 = vsyncadd [#allocation3], 4294950912  ;;  %vm333_vm0 = vcmask 916480   ;;  %369 = vmatprep.mubr.bf16.mxu0 %v1528_v5  ;;  %v1422_v10 = vmov 0   ;;  %v177_v11 = vld [vmem:[#allocation2 + $0x8] sm:$0xff]  ;;  %v176_v13 = vld [vmem:[#allocation2] sm:$0xff] }
  0x4c   :  { %1274 = vmatprep.mubr.msk.bf16.mxu1 %vm333_vm0, %v1538_v9  ;;  %1324 = vset.pattern.permute.xlu0 %v1422_v10  ;;  %v241_v12 = vld [vmem:[#allocation2 + $0x208] sm:$0xff]  ;;  %v240_v14 = vld [vmem:[#allocation2 + $0x200] sm:$0xff] }
  0x4d   :  { %310 = vperm.xlu0 %1324, %v167_v7   ;;  %337 = vmatprep.subr.bf16.mxu0 %v177_v11  ;;  %v181_v15 = vld [vmem:[#allocation2 + $0x28] sm:$0xff]  ;;  %v180_v17 = vld [vmem:[#allocation2 + $0x20] sm:$0xff] }
  0x4e   :  { %378 = vmatprep.subr.bf16.mxu1 %v241_v12  ;;  %v245_v16 = vld [vmem:[#allocation2 + $0x228] sm:$0xff]  ;;  %338 = vmatpush1.bf16.msra.mxu0 %v176_v13  ;;  %v244_v18 = vld [vmem:[#allocation2 + $0x220] sm:$0xff]  ;;  %v179_v12 = vld [vmem:[#allocation2 + $0x18] sm:$0xff] }
  0x4f   :  { %379 = vmatpush1.bf16.msra.mxu1 %v240_v14  ;;  %339 = vmatprep.subr.bf16.mxu0 %v181_v15  ;;  %v185_v19 = vld [vmem:[#allocation2 + $0x48] sm:$0xff]  ;;  %v184_v21 = vld [vmem:[#allocation2 + $0x40] sm:$0xff]  ;;  %v178_v14 = vld [vmem:[#allocation2 + $0x10] sm:$0xff] }
  0x50   :  { %380 = vmatprep.subr.bf16.mxu1 %v245_v16  ;;  %v249_v20 = vld [vmem:[#allocation2 + $0x248] sm:$0xff]  ;;  %v248_v22 = vld [vmem:[#allocation2 + $0x240] sm:$0xff]  ;;  %v183_v15 = vld [vmem:[#allocation2 + $0x38] sm:$0xff] }
  0x51   :  { %503 = vperm.xlu0 %1324, %v168_v8   ;;  %v189_v23 = vld [vmem:[#allocation2 + $0x68] sm:$0xff]  ;;  %v188_v25 = vld [vmem:[#allocation2 + $0x60] sm:$0xff]  ;;  %v243_v16 = vld [vmem:[#allocation2 + $0x218] sm:$0xff] }
  0x52   :  { %340 = vmatpush1.bf16.msra.mxu0 %v180_v17  ;;  %v253_v24 = vld [vmem:[#allocation2 + $0x268] sm:$0xff]  ;;  %v252_v26 = vld [vmem:[#allocation2 + $0x260] sm:$0xff]  ;;  %v182_v17 = vld [vmem:[#allocation2 + $0x30] sm:$0xff] }
  0x53   :  { %381 = vmatpush1.bf16.msra.mxu1 %v244_v18  ;;  %341 = vmatprep.subr.bf16.mxu0 %v185_v19  ;;  %v193_v27 = vld [vmem:[#allocation2 + $0x88] sm:$0xff]  ;;  %v192_v29 = vld [vmem:[#allocation2 + $0x80] sm:$0xff]  ;;  %v242_v18 = vld [vmem:[#allocation2 + $0x210] sm:$0xff] }
  0x54   :  { %382 = vmatprep.subr.bf16.mxu1 %v249_v20  ;;  %v257_v28 = vld [vmem:[#allocation2 + $0x288] sm:$0xff]  ;;  %v256_v30 = vld [vmem:[#allocation2 + $0x280] sm:$0xff]  ;;  %v187_v19 = vld [vmem:[#allocation2 + $0x58] sm:$0xff] }
  0x55   :  { %v197_v31 = vld [vmem:[#allocation2 + $0xa8] sm:$0xff]  ;;  %v196_v33 = vld [vmem:[#allocation2 + $0xa0] sm:$0xff]  ;;  %v247_v20 = vld [vmem:[#allocation2 + $0x238] sm:$0xff] }
  0x56   :  { %342 = vmatpush1.bf16.msra.mxu0 %v184_v21  ;;  %v261_v32 = vld [vmem:[#allocation2 + $0x2a8] sm:$0xff]  ;;  %v260_v34 = vld [vmem:[#allocation2 + $0x2a0] sm:$0xff]  ;;  %v186_v21 = vld [vmem:[#allocation2 + $0x50] sm:$0xff] }
  0x57   :  { %383 = vmatpush1.bf16.msra.mxu1 %v248_v22  ;;  %343 = vmatprep.subr.bf16.mxu0 %v189_v23  ;;  %v201_v35 = vld [vmem:[#allocation2 + $0xc8] sm:$0xff]  ;;  %v200_v37 = vld [vmem:[#allocation2 + $0xc0] sm:$0xff]  ;;  %v246_v22 = vld [vmem:[#allocation2 + $0x230] sm:$0xff] }
  0x58   :  { %384 = vmatprep.subr.bf16.mxu1 %v253_v24  ;;  %v265_v36 = vld [vmem:[#allocation2 + $0x2c8] sm:$0xff]  ;;  %v264_v38 = vld [vmem:[#allocation2 + $0x2c0] sm:$0xff]  ;;  %v191_v23 = vld [vmem:[#allocation2 + $0x78] sm:$0xff] }
  0x59   :  { %v205_v39 = vld [vmem:[#allocation2 + $0xe8] sm:$0xff]  ;;  %v204_v41 = vld [vmem:[#allocation2 + $0xe0] sm:$0xff]  ;;  %v251_v24 = vld [vmem:[#allocation2 + $0x258] sm:$0xff] }
  0x5a   :  { %344 = vmatpush1.bf16.msra.mxu0 %v188_v25  ;;  %v269_v40 = vld [vmem:[#allocation2 + $0x2e8] sm:$0xff]  ;;  %v268_v42 = vld [vmem:[#allocation2 + $0x2e0] sm:$0xff]  ;;  %v190_v25 = vld [vmem:[#allocation2 + $0x70] sm:$0xff] }
  0x5b   :  { %385 = vmatpush1.bf16.msra.mxu1 %v252_v26  ;;  %345 = vmatprep.subr.bf16.mxu0 %v193_v27  ;;  %v209_v43 = vld [vmem:[#allocation2 + $0x108] sm:$0xff]  ;;  %v208_v45 = vld [vmem:[#allocation2 + $0x100] sm:$0xff]  ;;  %v250_v26 = vld [vmem:[#allocation2 + $0x250] sm:$0xff] }
  0x5c   :  { %386 = vmatprep.subr.bf16.mxu1 %v257_v28  ;;  %v273_v44 = vld [vmem:[#allocation2 + $0x308] sm:$0xff]  ;;  %v272_v46 = vld [vmem:[#allocation2 + $0x300] sm:$0xff]  ;;  %v255_v27 = vld [vmem:[#allocation2 + $0x278] sm:$0xff] }
  0x5d   :  { %v213_v47 = vld [vmem:[#allocation2 + $0x128] sm:$0xff]  ;;  %v212_v49 = vld [vmem:[#allocation2 + $0x120] sm:$0xff]  ;;  %v194_v28 = vld [vmem:[#allocation2 + $0x90] sm:$0xff] }
  0x5e   :  { %346 = vmatpush1.bf16.msra.mxu0 %v192_v29  ;;  %v277_v48 = vld [vmem:[#allocation2 + $0x328] sm:$0xff]  ;;  %v276_v50 = vld [vmem:[#allocation2 + $0x320] sm:$0xff]  ;;  %v254_v29 = vld [vmem:[#allocation2 + $0x270] sm:$0xff] }
  0x5f   :  { %387 = vmatpush1.bf16.msra.mxu1 %v256_v30  ;;  %347 = vmatprep.subr.bf16.mxu0 %v197_v31  ;;  %v217_v51 = vld [vmem:[#allocation2 + $0x148] sm:$0xff]  ;;  %v216_v53 = vld [vmem:[#allocation2 + $0x140] sm:$0xff]  ;;  %v199_v30 = vld [vmem:[#allocation2 + $0xb8] sm:$0xff] }
  0x60   :  { %388 = vmatprep.subr.bf16.mxu1 %v261_v32  ;;  %v281_v52 = vld [vmem:[#allocation2 + $0x348] sm:$0xff]  ;;  %v280_v54 = vld [vmem:[#allocation2 + $0x340] sm:$0xff]  ;;  %v259_v31 = vld [vmem:[#allocation2 + $0x298] sm:$0xff] }
  0x61   :  { %v221_v55 = vld [vmem:[#allocation2 + $0x168] sm:$0xff]  ;;  %v220_v57 = vld [vmem:[#allocation2 + $0x160] sm:$0xff]  ;;  %v258_v32 = vld [vmem:[#allocation2 + $0x290] sm:$0xff] }
  0x62   :  { %348 = vmatpush1.bf16.msra.mxu0 %v196_v33  ;;  %v285_v56 = vld [vmem:[#allocation2 + $0x368] sm:$0xff]  ;;  %v284_v58 = vld [vmem:[#allocation2 + $0x360] sm:$0xff]  ;;  %v203_v33 = vld [vmem:[#allocation2 + $0xd8] sm:$0xff] }
  0x63   :  { %389 = vmatpush1.bf16.msra.mxu1 %v260_v34  ;;  %349 = vmatprep.subr.bf16.mxu0 %v201_v35  ;;  %v225_v59 = vld [vmem:[#allocation2 + $0x188] sm:$0xff]  ;;  %v224_v61 = vld [vmem:[#allocation2 + $0x180] sm:$0xff]  ;;  %v263_v34 = vld [vmem:[#allocation2 + $0x2b8] sm:$0xff] }
  0x64   :  { %390 = vmatprep.subr.bf16.mxu1 %v265_v36  ;;  %v289_v60 = vld [vmem:[#allocation2 + $0x388] sm:$0xff]  ;;  %v288_v62 = vld [vmem:[#allocation2 + $0x380] sm:$0xff]  ;;  %v202_v35 = vld [vmem:[#allocation2 + $0xd0] sm:$0xff] }
  0x65   :  { %v229_v63 = vld [vmem:[#allocation2 + $0x1a8] sm:$0xff]  ;;  %v228_v1 = vld [vmem:[#allocation2 + $0x1a0] sm:$0xff]  ;;  %v262_v36 = vld [vmem:[#allocation2 + $0x2b0] sm:$0xff] }
  0x66   :  { %350 = vmatpush1.bf16.msra.mxu0 %v200_v37  ;;  %v293_v0 = vld [vmem:[#allocation2 + $0x3a8] sm:$0xff]  ;;  %v292_v2 = vld [vmem:[#allocation2 + $0x3a0] sm:$0xff]  ;;  %v207_v37 = vld [vmem:[#allocation2 + $0xf8] sm:$0xff] }
  0x67   :  { %391 = vmatpush1.bf16.msra.mxu1 %v264_v38  ;;  %351 = vmatprep.subr.bf16.mxu0 %v205_v39  ;;  %v233_v3 = vld [vmem:[#allocation2 + $0x1c8] sm:$0xff]  ;;  %v232_v8 = vld [vmem:[#allocation2 + $0x1c0] sm:$0xff]  ;;  %v267_v38 = vld [vmem:[#allocation2 + $0x2d8] sm:$0xff] }
  0x68   :  { %392 = vmatprep.subr.bf16.mxu1 %v269_v40  ;;  %v297_v7 = vld [vmem:[#allocation2 + $0x3c8] sm:$0xff]  ;;  %v296_v10 = vld [vmem:[#allocation2 + $0x3c0] sm:$0xff]  ;;  %v206_v39 = vld [vmem:[#allocation2 + $0xf0] sm:$0xff] }
  0x69   :  { %v237_v11 = vld [vmem:[#allocation2 + $0x1e8] sm:$0xff]  ;;  %v236_v13 = vld [vmem:[#allocation2 + $0x1e0] sm:$0xff]  ;;  %v266_v40 = vld [vmem:[#allocation2 + $0x2d0] sm:$0xff] }
  0x6a   :  { %352 = vmatpush1.bf16.msra.mxu0 %v204_v41  ;;  %v211_v41 = vld [vmem:[#allocation2 + $0x118] sm:$0xff] }
  0x6b   :  { %393 = vmatpush1.bf16.msra.mxu1 %v268_v42  ;;  %353 = vmatprep.subr.bf16.mxu0 %v209_v43  ;;  %v271_v42 = vld [vmem:[#allocation2 + $0x2f8] sm:$0xff]  ;;  %v210_v43 = vld [vmem:[#allocation2 + $0x110] sm:$0xff] }
  0x6c   :  { %394 = vmatprep.subr.bf16.mxu1 %v273_v44  ;;  %v270_v44 = vld [vmem:[#allocation2 + $0x2f0] sm:$0xff] }
  0x6e   :  { %354 = vmatpush1.bf16.msra.mxu0 %v208_v45  ;;  %v215_v45 = vld [vmem:[#allocation2 + $0x138] sm:$0xff] }
  0x6f   :  { %395 = vmatpush1.bf16.msra.mxu1 %v272_v46  ;;  %355 = vmatprep.subr.bf16.mxu0 %v213_v47  ;;  %v275_v46 = vld [vmem:[#allocation2 + $0x318] sm:$0xff]  ;;  %v214_v47 = vld [vmem:[#allocation2 + $0x130] sm:$0xff] }
  0x70   :  { %396 = vmatprep.subr.bf16.mxu1 %v277_v48  ;;  %v274_v48 = vld [vmem:[#allocation2 + $0x310] sm:$0xff] }
  0x72   :  { %356 = vmatpush1.bf16.msra.mxu0 %v212_v49  ;;  %v219_v49 = vld [vmem:[#allocation2 + $0x158] sm:$0xff] }
  0x73   :  { %397 = vmatpush1.bf16.msra.mxu1 %v276_v50  ;;  %357 = vmatprep.subr.bf16.mxu0 %v217_v51  ;;  %v279_v50 = vld [vmem:[#allocation2 + $0x338] sm:$0xff]  ;;  %v218_v51 = vld [vmem:[#allocation2 + $0x150] sm:$0xff] }
  0x74   :  { %398 = vmatprep.subr.bf16.mxu1 %v281_v52  ;;  %v278_v52 = vld [vmem:[#allocation2 + $0x330] sm:$0xff] }
  0x76   :  { %358 = vmatpush1.bf16.msra.mxu0 %v216_v53  ;;  %v223_v53 = vld [vmem:[#allocation2 + $0x178] sm:$0xff] }
  0x77   :  { %399 = vmatpush1.bf16.msra.mxu1 %v280_v54  ;;  %359 = vmatprep.subr.bf16.mxu0 %v221_v55  ;;  %v283_v54 = vld [vmem:[#allocation2 + $0x358] sm:$0xff]  ;;  %v222_v55 = vld [vmem:[#allocation2 + $0x170] sm:$0xff] }
  0x78   :  { %400 = vmatprep.subr.bf16.mxu1 %v285_v56  ;;  %v282_v56 = vld [vmem:[#allocation2 + $0x350] sm:$0xff] }
  0x7a   :  { %360 = vmatpush1.bf16.msra.mxu0 %v220_v57  ;;  %v227_v57 = vld [vmem:[#allocation2 + $0x198] sm:$0xff] }
  0x7b   :  { %401 = vmatpush1.bf16.msra.mxu1 %v284_v58  ;;  %361 = vmatprep.subr.bf16.mxu0 %v225_v59  ;;  %v287_v58 = vld [vmem:[#allocation2 + $0x378] sm:$0xff]  ;;  %v226_v59 = vld [vmem:[#allocation2 + $0x190] sm:$0xff] }
  0x7c   :  { %402 = vmatprep.subr.bf16.mxu1 %v289_v60  ;;  %v286_v60 = vld [vmem:[#allocation2 + $0x370] sm:$0xff] }
  0x7e   :  { %362 = vmatpush1.bf16.msra.mxu0 %v224_v61  ;;  %v231_v61 = vld [vmem:[#allocation2 + $0x1b8] sm:$0xff] }
  0x7f   :  { %403 = vmatpush1.bf16.msra.mxu1 %v288_v62  ;;  %363 = vmatprep.subr.bf16.mxu0 %v229_v63  ;;  %v291_v62 = vld [vmem:[#allocation2 + $0x398] sm:$0xff]  ;;  %v230_v63 = vld [vmem:[#allocation2 + $0x1b0] sm:$0xff] }
  0x80   :  { %404 = vmatprep.subr.bf16.mxu1 %v293_v0  ;;  %v290_v0 = vld [vmem:[#allocation2 + $0x390] sm:$0xff] }
  0x82   :  { %364 = vmatpush1.bf16.msra.mxu0 %v228_v1  ;;  %v235_v1 = vld [vmem:[#allocation2 + $0x1d8] sm:$0xff] }
  0x83   :  { %405 = vmatpush1.bf16.msra.mxu1 %v292_v2  ;;  %365 = vmatprep.subr.bf16.mxu0 %v233_v3  ;;  %v295_v2 = vld [vmem:[#allocation2 + $0x3b8] sm:$0xff]  ;;  %v234_v3 = vld [vmem:[#allocation2 + $0x1d0] sm:$0xff] }
  0x84   :  { %406 = vmatprep.subr.bf16.mxu1 %v297_v7  ;;  %v294_v7 = vld [vmem:[#allocation2 + $0x3b0] sm:$0xff] }
  0x86   :  { %366 = vmatpush1.bf16.msra.mxu0 %v232_v8  ;;  %v239_v8 = vld [vmem:[#allocation2 + $0x1f8] sm:$0xff] }
  0x87   :  { %407 = vmatpush1.bf16.msra.mxu1 %v296_v10  ;;  %367 = vmatprep.subr.bf16.mxu0 %v237_v11  ;;  %v299_v10 = vld [vmem:[#allocation2 + $0x3d8] sm:$0xff]  ;;  %v238_v11 = vld [vmem:[#allocation2 + $0x1f0] sm:$0xff] }
  0x88   :  { %419 = vmatprep.subr.bf16.mxu1 %v179_v12  ;;  %v298_v12 = vld [vmem:[#allocation2 + $0x3d0] sm:$0xff] }
  0x8a   :  { %411 = vmatmul.mubr.bf16.vlgmr.msra.gmra.mrb[0].mxu1 %v1530_v6  ;;  %368 = vmatpush1.bf16.msra.mxu0 %v236_v13  ;;  %v313_v13 = vlaneseq }
  0x8b   :  { %420 = vmatpush1.bf16.msra.mxu1 %v178_v14  ;;  %460 = vmatprep.subr.bf16.mxu0 %v243_v16  ;;  %v301_v16 = vld [vmem:[#allocation2 + $0x3e8] sm:$0x1] }
  0x8c   :  { %421 = vmatprep.subr.bf16.mxu1 %v183_v15  ;;  %451 = vmatprep.mubr.bf16.mxu1 %v1528_v5  ;;  %v195_v5 = vld [vmem:[#allocation2 + $0x98] sm:$0xff]  ;;  %v314_v14 = vshrl.u32 %v313_v13, 7  ;;  %v300_v15 = vld [vmem:[#allocation2 + $0x3e0] sm:$0x1] }
  0x8d   :  { %370 = vmatmul.mubr.bf16.vlgmr.msra.gmra.mrb[0].mxu0 %v1526_v4 }
  0x8e   :  { %461 = vmatpush1.bf16.msra.mxu0 %v242_v18  ;;  %1275 = vmatprep.mubr.msk.bf16.mxu0 %vm333_vm0, %v1538_v9  ;;  %v198_v9 = vld [vmem:[#allocation2 + $0xb0] sm:$0xff]  ;;  %v1550_v18 = vsub.s32 0, %v314_v14 }
  0x8f   :  { %422 = vmatpush1.bf16.msra.mxu1 %v182_v17  ;;  %462 = vmatprep.subr.bf16.mxu0 %v247_v20  ;;  %v304_v17 = vunpack.c.l.bf16 %v300_v15 }
  0x90   :  { %423 = vmatprep.subr.bf16.mxu1 %v187_v19  ;;  %v305_v19 = vunpack.c.l.bf16 %v301_v16 }
  0x92   :  { %463 = vmatpush1.bf16.msra.mxu0 %v246_v22  ;;  %v1553_v22 = vsub.s32 1, %v314_v14 }
  0x93   :  { %424 = vmatpush1.bf16.msra.mxu1 %v186_v21  ;;  %464 = vmatprep.subr.bf16.mxu0 %v251_v24  ;;  %v316_v21 = vrot.slane %v304_v17, %v1550_v18 }
  0x94   :  { %425 = vmatprep.subr.bf16.mxu1 %v191_v23  ;;  %v320_v23 = vrot.slane %v305_v19, %v1550_v18 }
  0x96   :  { %465 = vmatpush1.bf16.msra.mxu0 %v250_v26 }
  0x97   :  { %426 = vmatpush1.bf16.msra.mxu1 %v190_v25  ;;  %466 = vmatprep.subr.bf16.mxu0 %v255_v27 }
  0x98   :  { %427 = vmatprep.subr.bf16.mxu1 %v195_v5 }
  0x9a   :  { %467 = vmatpush1.bf16.msra.mxu0 %v254_v29 }
  0x9b   :  { %428 = vmatpush1.bf16.msra.mxu1 %v194_v28  ;;  %468 = vmatprep.subr.bf16.mxu0 %v259_v31  ;;  %v513_v28 = vrot.slane %v305_v19, %v1553_v22  ;;  %v530_v31 = vld [vmem:[#allocation7] sm:$0xf] }
  0x9c   :  { %429 = vmatprep.subr.bf16.mxu1 %v199_v30 }
  0x9e   :  { %469 = vmatpush1.bf16.msra.mxu0 %v258_v32 }
  0x9f   :  { %430 = vmatpush1.bf16.msra.mxu1 %v198_v9  ;;  %470 = vmatprep.subr.bf16.mxu0 %v263_v34 }
  0xa0   :  { %431 = vmatprep.subr.bf16.mxu1 %v203_v33 }
  0xa2   :  { %471 = vmatpush1.bf16.msra.mxu0 %v262_v36 }
  0xa3   :  { %432 = vmatpush1.bf16.msra.mxu1 %v202_v35  ;;  %472 = vmatprep.subr.bf16.mxu0 %v267_v38  ;;  %v535_v38 = vrot.slane %v530_v31, %v1550_v18 }
  0xa4   :  { %433 = vmatprep.subr.bf16.mxu1 %v207_v37 }
  0xa6   :  { %473 = vmatpush1.bf16.msra.mxu0 %v266_v40 }
  0xa7   :  { %434 = vmatpush1.bf16.msra.mxu1 %v206_v39  ;;  %474 = vmatprep.subr.bf16.mxu0 %v271_v42 }
  0xa8   :  { %435 = vmatprep.subr.bf16.mxu1 %v211_v41  ;;  %v539_v41 = vrot.slane %v530_v31, %v1553_v22 }
  0xaa   :  { %475 = vmatpush1.bf16.msra.mxu0 %v270_v44 }
  0xab   :  { %436 = vmatpush1.bf16.msra.mxu1 %v210_v43  ;;  %476 = vmatprep.subr.bf16.mxu0 %v275_v46 }
  0xac   :  { %437 = vmatprep.subr.bf16.mxu1 %v215_v45 }
  0xae   :  { %477 = vmatpush1.bf16.msra.mxu0 %v274_v48 }
  0xaf   :  { %438 = vmatpush1.bf16.msra.mxu1 %v214_v47  ;;  %478 = vmatprep.subr.bf16.mxu0 %v279_v50 }
  0xb0   :  { %439 = vmatprep.subr.bf16.mxu1 %v219_v49 }
  0xb2   :  { %479 = vmatpush1.bf16.msra.mxu0 %v278_v52  ;;  %v302_v52 = vld [vmem:[#allocation2 + $0x3f0] sm:$0x1] }
  0xb3   :  { %440 = vmatpush1.bf16.msra.mxu1 %v218_v51  ;;  %480 = vmatprep.subr.bf16.mxu0 %v283_v54  ;;  %v306_v54 = vunpack.c.l.bf16 %v302_v52 }
  0xb4   :  { %441 = vmatprep.subr.bf16.mxu1 %v223_v53  ;;  %v303_v53 = vld [vmem:[#allocation2 + $0x3f8] sm:$0x1] }
  0xb6   :  { %481 = vmatpush1.bf16.msra.mxu0 %v282_v56  ;;  %v324_v56 = vrot.slane %v306_v54, %v1550_v18 }
  0xb7   :  { %442 = vmatpush1.bf16.msra.mxu1 %v222_v55  ;;  %482 = vmatprep.subr.bf16.mxu0 %v287_v58  ;;  %v307_v55 = vunpack.c.l.bf16 %v303_v53 }
  0xb8   :  { %443 = vmatprep.subr.bf16.mxu1 %v227_v57 }
  0xb9   :  { %v328_v57 = vrot.slane %v307_v55, %v1550_v18 }
  0xba   :  { %483 = vmatpush1.bf16.msra.mxu0 %v286_v60  ;;  %v517_v60 = vrot.slane %v306_v54, %v1553_v22 }
  0xbb   :  { %444 = vmatpush1.bf16.msra.mxu1 %v226_v59  ;;  %484 = vmatprep.subr.bf16.mxu0 %v291_v62  ;;  %v521_v62 = vrot.slane %v307_v55, %v1553_v22 }
  0xbc   :  { %445 = vmatprep.subr.bf16.mxu1 %v231_v61  ;;  %v1565_v61 = vsub.s32 2, %v314_v14 }
  0xbe   :  { %485 = vmatpush1.bf16.msra.mxu0 %v290_v0  ;;  %v543_v15 = vrot.slane %v530_v31, %v1565_v61 }
  0xbf   :  { %446 = vmatpush1.bf16.msra.mxu1 %v230_v63  ;;  %486 = vmatprep.subr.bf16.mxu0 %v295_v2 }
  0xc0   :  { %447 = vmatprep.subr.bf16.mxu1 %v235_v1  ;;  %v1568_v1 = vsub.s32 3, %v314_v14 }
  0xc2   :  { %487 = vmatpush1.bf16.msra.mxu0 %v294_v7 }
  0xc3   :  { %448 = vmatpush1.bf16.msra.mxu1 %v234_v3  ;;  %488 = vmatprep.subr.bf16.mxu0 %v299_v10 }
  0xc4   :  { %449 = vmatprep.subr.bf16.mxu1 %v239_v8 }
  0xc6   :  { %489 = vmatpush1.bf16.msra.mxu0 %v298_v12 }
  0xc7   :  { %450 = vmatpush1.bf16.msra.mxu1 %v238_v11 }
  0xc9   :  { %493 = vmatmul.mubr.bf16.vlgmr.msra.gmra.mrb[4].mxu0 %v1530_v6  ;;  %v509_v6 = vrot.slane %v304_v17, %v1553_v22 }
  0xca   :  { %452 = vmatmul.mubr.bf16.vlgmr.msra.gmra.mrb[4].mxu1 %v1526_v4 }
  0xcc   :  { %v311_v20 = vpop.permute.xlu0 %310 }
  0xcd   :  { %v329_v4 = vmul.f32 %v316_v21, %v311_v20  ;;  %v330_v5 = vmul.f32 %v320_v23, %v311_v20  ;;  %v331_v58 = vmul.f32 %v324_v56, %v311_v20  ;;  %v332_v59 = vmul.f32 %v328_v57, %v311_v20 }
  0xce   :  { %v547_v21 = vrot.slane %v530_v31, %v1568_v1 }
  0xd0   :  { %v504_v27 = vpop.permute.xlu0 %503 }
  0xd1   :  { %v522_v33 = vmul.f32 %v509_v6, %v504_v27  ;;  %v523_v35 = vmul.f32 %v513_v28, %v504_v27  ;;  %v524_v12 = vmul.f32 %v517_v60, %v504_v27  ;;  %v525_v19 = vmul.f32 %v521_v62, %v504_v27 }
 0x15d   :  { %v412_v24 = vpop.f32.mrb[0].mxu1 }
 0x15e   :  { %v414_v25 = vpop.f32.mrb[1].mxu1 }
 0x15f   :  { %v416_v26 = vpop.f32.mrb[2].mxu1 }
 0x160   :  { %v417_v29 = vpop.f32.mrb[3].mxu1  ;;  %v371_v30 = vpop.f32.mrb[0].mxu0 }
 0x161   :  { %v372_v9 = vadd.f32 %v371_v30, %v329_v4  ;;  %v373_v32 = vpop.f32.mrb[1].mxu0 }
 0x162   :  { %v374_v34 = vadd.f32 %v373_v32, %v330_v5  ;;  %v375_v36 = vpop.f32.mrb[2].mxu0 }
 0x163   :  { %v413_v37 = vadd.f32 %v412_v24, %v372_v9  ;;  %v376_v39 = vpop.f32.mrb[3].mxu0 }
 0x164   :  { %v415_v40 = vadd.f32 %v414_v25, %v374_v34 }
 0x165   :  { %v526_v42 = vadd.f32 %v522_v33, %v413_v37 }
 0x166   :  { %v527_v43 = vadd.f32 %v523_v35, %v415_v40 }
 0x167   :  { %v552_v44 = vadd.f32 %v535_v38, %v526_v42 }
 0x168   :  { %v553_v45 = vadd.f32 %v539_v41, %v527_v43 }
 0x169   :  { %v556_v46 = vmul.f32 0.01, %v552_v44 }
 0x16a   :  { %v557_v47 = vmul.f32 0.01, %v553_v45 }
 0x16b   :  { %v560_v48 = vmax.f32 %v552_v44, %v556_v46 }
 0x16c   :  { %v561_v49 = vmax.f32 %v553_v45, %v557_v47 }
 0x16d   :  { %v1560_v50 = vpack.c.bf16 %v560_v48, %v560_v48 }
 0x16e   :  { %v565_v51 = vpack.c.bf16 %v561_v49, %v561_v49 }
 0x19c   :  { %v494_v0 = vpop.f32.mrb[4].mxu0 }
 0x19d   :  { %v453_v63 = vpop.f32.mrb[4].mxu1  ;;  %v496_v7 = vpop.f32.mrb[5].mxu0 }
 0x19e   :  { %v454_v2 = vadd.f32 %v453_v63, %v331_v58  ;;  %v455_v3 = vpop.f32.mrb[5].mxu1  ;;  %v498_v11 = vpop.f32.mrb[6].mxu0 }
 0x19f   :  { %v456_v8 = vadd.f32 %v455_v3, %v332_v59  ;;  %v457_v10 = vpop.f32.mrb[6].mxu1  ;;  %v499_v17 = vpop.f32.mrb[7].mxu0 }
 0x1a0   :  { %v495_v13 = vadd.f32 %v494_v0, %v454_v2  ;;  %v458_v16 = vpop.f32.mrb[7].mxu1 }
 0x1a1   :  { %v497_v20 = vadd.f32 %v496_v7, %v456_v8 }
 0x1a2   :  { %v528_v23 = vadd.f32 %v524_v12, %v495_v13 }
 0x1a3   :  { %v529_v24 = vadd.f32 %v525_v19, %v497_v20 }
 0x1a4   :  { %v554_v14 = vadd.f32 %v543_v15, %v528_v23 }
 0x1a5   :  { %v555_v25 = vadd.f32 %v547_v21, %v529_v24 }
 0x1a6   :  { %v558_v4 = vmul.f32 0.01, %v554_v14 }
 0x1a7   :  { %v559_v6 = vmul.f32 0.01, %v555_v25 }
 0x1a8   :  { %v562_v26 = vmax.f32 %v554_v14, %v558_v4 }
 0x1a9   :  { %v563_v5 = vmax.f32 %v555_v25, %v559_v6 }
 0x1aa   :  { %v1572_v28 = vpack.c.bf16 %v562_v26, %v562_v26 }
 0x1ab   :  { %v1574_v29 = vpack.c.bf16 %v563_v5, %v563_v5 }
 0x1ac   :  { %1397 = dma.done.wait [#allocation3 + $0x1], 16384 }
 0x1ad   :  { %1398 = vsyncadd [#allocation3 + $0x1], 4294950912  ;;  %760 = vmatprep.mubr.bf16.mxu0 %v565_v51  ;;  %842 = vmatprep.mubr.bf16.mxu1 %v565_v51  ;;  %v578_v27 = vld [vmem:[#allocation2 + $0x408] sm:$0xff]  ;;  %v580_v30 = vld [vmem:[#allocation2 + $0x418] sm:$0xff] }
 0x1ae   :  { %v577_v9 = vld [vmem:[#allocation2 + $0x400] sm:$0xff]  ;;  %728 = vmatprep.subr.bf16.mxu0 %v578_v27  ;;  %810 = vmatprep.subr.bf16.mxu1 %v580_v30  ;;  %v579_v31 = vld [vmem:[#allocation2 + $0x410] sm:$0xff]  ;;  %v582_v32 = vld [vmem:[#allocation2 + $0x428] sm:$0xff] }
 0x1af   :  { %v584_v33 = vld [vmem:[#allocation2 + $0x438] sm:$0xff]  ;;  %729 = vmatpush1.bf16.msra.mxu0 %v577_v9  ;;  %811 = vmatpush1.bf16.msra.mxu1 %v579_v31  ;;  %v581_v34 = vld [vmem:[#allocation2 + $0x420] sm:$0xff]  ;;  %v583_v35 = vld [vmem:[#allocation2 + $0x430] sm:$0xff] }
 0x1b0   :  { %730 = vmatprep.subr.bf16.mxu0 %v582_v32  ;;  %812 = vmatprep.subr.bf16.mxu1 %v584_v33  ;;  %v586_v36 = vld [vmem:[#allocation2 + $0x448] sm:$0xff]  ;;  %v588_v37 = vld [vmem:[#allocation2 + $0x458] sm:$0xff]  ;;  %v585_v38 = vld [vmem:[#allocation2 + $0x440] sm:$0xff] }
 0x1b1   :  { %v587_v39 = vld [vmem:[#allocation2 + $0x450] sm:$0xff]  ;;  %v590_v40 = vld [vmem:[#allocation2 + $0x468] sm:$0xff]  ;;  %v592_v41 = vld [vmem:[#allocation2 + $0x478] sm:$0xff] }
 0x1b2   :  { %v589_v42 = vld [vmem:[#allocation2 + $0x460] sm:$0xff]  ;;  %v591_v43 = vld [vmem:[#allocation2 + $0x470] sm:$0xff]  ;;  %v594_v44 = vld [vmem:[#allocation2 + $0x488] sm:$0xff] }
 0x1b3   :  { %731 = vmatpush1.bf16.msra.mxu0 %v581_v34  ;;  %813 = vmatpush1.bf16.msra.mxu1 %v583_v35  ;;  %v596_v45 = vld [vmem:[#allocation2 + $0x498] sm:$0xff]  ;;  %v593_v46 = vld [vmem:[#allocation2 + $0x480] sm:$0xff]  ;;  %v595_v47 = vld [vmem:[#allocation2 + $0x490] sm:$0xff] }
 0x1b4   :  { %732 = vmatprep.subr.bf16.mxu0 %v586_v36  ;;  %814 = vmatprep.subr.bf16.mxu1 %v588_v37  ;;  %v598_v48 = vld [vmem:[#allocation2 + $0x4a8] sm:$0xff]  ;;  %v600_v49 = vld [vmem:[#allocation2 + $0x4b8] sm:$0xff]  ;;  %v597_v51 = vld [vmem:[#allocation2 + $0x4a0] sm:$0xff] }
 0x1b5   :  { %v599_v52 = vld [vmem:[#allocation2 + $0x4b0] sm:$0xff]  ;;  %v602_v53 = vld [vmem:[#allocation2 + $0x4c8] sm:$0xff]  ;;  %v604_v54 = vld [vmem:[#allocation2 + $0x4d8] sm:$0xff] }
 0x1b6   :  { %v601_v55 = vld [vmem:[#allocation2 + $0x4c0] sm:$0xff]  ;;  %v603_v56 = vld [vmem:[#allocation2 + $0x4d0] sm:$0xff]  ;;  %v606_v57 = vld [vmem:[#allocation2 + $0x4e8] sm:$0xff] }
 0x1b7   :  { %733 = vmatpush1.bf16.msra.mxu0 %v585_v38  ;;  %815 = vmatpush1.bf16.msra.mxu1 %v587_v39  ;;  %v608_v58 = vld [vmem:[#allocation2 + $0x4f8] sm:$0xff]  ;;  %v605_v59 = vld [vmem:[#allocation2 + $0x4e0] sm:$0xff]  ;;  %v607_v60 = vld [vmem:[#allocation2 + $0x4f0] sm:$0xff] }
 0x1b8   :  { %734 = vmatprep.subr.bf16.mxu0 %v590_v40  ;;  %816 = vmatprep.subr.bf16.mxu1 %v592_v41  ;;  %v610_v62 = vld [vmem:[#allocation2 + $0x508] sm:$0xff]  ;;  %v612_v63 = vld [vmem:[#allocation2 + $0x518] sm:$0xff]  ;;  %v609_v0 = vld [vmem:[#allocation2 + $0x500] sm:$0xff] }
 0x1b9   :  { %v611_v2 = vld [vmem:[#allocation2 + $0x510] sm:$0xff]  ;;  %v614_v3 = vld [vmem:[#allocation2 + $0x528] sm:$0xff]  ;;  %v616_v7 = vld [vmem:[#allocation2 + $0x538] sm:$0xff] }
 0x1ba   :  { %v613_v8 = vld [vmem:[#allocation2 + $0x520] sm:$0xff]  ;;  %v615_v10 = vld [vmem:[#allocation2 + $0x530] sm:$0xff]  ;;  %v618_v11 = vld [vmem:[#allocation2 + $0x548] sm:$0xff] }
 0x1bb   :  { %735 = vmatpush1.bf16.msra.mxu0 %v589_v42  ;;  %817 = vmatpush1.bf16.msra.mxu1 %v591_v43  ;;  %v620_v12 = vld [vmem:[#allocation2 + $0x558] sm:$0xff]  ;;  %v617_v13 = vld [vmem:[#allocation2 + $0x540] sm:$0xff]  ;;  %v619_v15 = vld [vmem:[#allocation2 + $0x550] sm:$0xff] }
 0x1bc   :  { %736 = vmatprep.subr.bf16.mxu0 %v594_v44  ;;  %818 = vmatprep.subr.bf16.mxu1 %v596_v45  ;;  %v622_v16 = vld [vmem:[#allocation2 + $0x568] sm:$0xff]  ;;  %v624_v17 = vld [vmem:[#allocation2 + $0x578] sm:$0xff]  ;;  %v621_v19 = vld [vmem:[#allocation2 + $0x560] sm:$0xff] }
 0x1bd   :  { %v623_v20 = vld [vmem:[#allocation2 + $0x570] sm:$0xff]  ;;  %v626_v21 = vld [vmem:[#allocation2 + $0x588] sm:$0xff]  ;;  %v628_v23 = vld [vmem:[#allocation2 + $0x598] sm:$0xff] }
 0x1be   :  { %v625_v24 = vld [vmem:[#allocation2 + $0x580] sm:$0xff]  ;;  %v627_v14 = vld [vmem:[#allocation2 + $0x590] sm:$0xff]  ;;  %v630_v25 = vld [vmem:[#allocation2 + $0x5a8] sm:$0xff] }
 0x1bf   :  { %737 = vmatpush1.bf16.msra.mxu0 %v593_v46  ;;  %819 = vmatpush1.bf16.msra.mxu1 %v595_v47  ;;  %v632_v4 = vld [vmem:[#allocation2 + $0x5b8] sm:$0xff]  ;;  %v629_v6 = vld [vmem:[#allocation2 + $0x5a0] sm:$0xff]  ;;  %v631_v26 = vld [vmem:[#allocation2 + $0x5b0] sm:$0xff] }
 0x1c0   :  { %738 = vmatprep.subr.bf16.mxu0 %v598_v48  ;;  %820 = vmatprep.subr.bf16.mxu1 %v600_v49  ;;  %v634_v5 = vld [vmem:[#allocation2 + $0x5c8] sm:$0xff]  ;;  %v636_v27 = vld [vmem:[#allocation2 + $0x5d8] sm:$0xff]  ;;  %v633_v30 = vld [vmem:[#allocation2 + $0x5c0] sm:$0xff] }
 0x1c1   :  { %v635_v9 = vld [vmem:[#allocation2 + $0x5d0] sm:$0xff]  ;;  %v638_v31 = vld [vmem:[#allocation2 + $0x5e8] sm:$0xff]  ;;  %v640_v32 = vld [vmem:[#allocation2 + $0x5f8] sm:$0xff] }
 0x1c2   :  { %v637_v33 = vld [vmem:[#allocation2 + $0x5e0] sm:$0xff]  ;;  %v639_v34 = vld [vmem:[#allocation2 + $0x5f0] sm:$0xff]  ;;  %v642_v35 = vld [vmem:[#allocation2 + $0x608] sm:$0xff] }
 0x1c3   :  { %739 = vmatpush1.bf16.msra.mxu0 %v597_v51  ;;  %821 = vmatpush1.bf16.msra.mxu1 %v599_v52  ;;  %v644_v36 = vld [vmem:[#allocation2 + $0x618] sm:$0xff]  ;;  %v641_v37 = vld [vmem:[#allocation2 + $0x600] sm:$0xff]  ;;  %v643_v38 = vld [vmem:[#allocation2 + $0x610] sm:$0xff] }
 0x1c4   :  { %740 = vmatprep.subr.bf16.mxu0 %v602_v53  ;;  %822 = vmatprep.subr.bf16.mxu1 %v604_v54  ;;  %v646_v39 = vld [vmem:[#allocation2 + $0x628] sm:$0xff]  ;;  %v648_v40 = vld [vmem:[#allocation2 + $0x638] sm:$0xff]  ;;  %v645_v41 = vld [vmem:[#allocation2 + $0x620] sm:$0xff] }
 0x1c5   :  { %v647_v42 = vld [vmem:[#allocation2 + $0x630] sm:$0xff]  ;;  %v650_v43 = vld [vmem:[#allocation2 + $0x648] sm:$0xff]  ;;  %v652_v44 = vld [vmem:[#allocation2 + $0x658] sm:$0xff] }
 0x1c6   :  { %v649_v45 = vld [vmem:[#allocation2 + $0x640] sm:$0xff]  ;;  %v651_v46 = vld [vmem:[#allocation2 + $0x650] sm:$0xff]  ;;  %v654_v47 = vld [vmem:[#allocation2 + $0x668] sm:$0xff] }
 0x1c7   :  { %741 = vmatpush1.bf16.msra.mxu0 %v601_v55  ;;  %823 = vmatpush1.bf16.msra.mxu1 %v603_v56  ;;  %v653_v48 = vld [vmem:[#allocation2 + $0x660] sm:$0xff]  ;;  %v655_v49 = vld [vmem:[#allocation2 + $0x670] sm:$0xff]  ;;  %v658_v51 = vld [vmem:[#allocation2 + $0x688] sm:$0xff] }
 0x1c8   :  { %742 = vmatprep.subr.bf16.mxu0 %v606_v57  ;;  %824 = vmatprep.subr.bf16.mxu1 %v608_v58  ;;  %v660_v52 = vld [vmem:[#allocation2 + $0x698] sm:$0xff]  ;;  %v659_v53 = vld [vmem:[#allocation2 + $0x690] sm:$0xff]  ;;  %v662_v54 = vld [vmem:[#allocation2 + $0x6a8] sm:$0xff] }
 0x1c9   :  { %v664_v55 = vld [vmem:[#allocation2 + $0x6b8] sm:$0xff]  ;;  %v661_v56 = vld [vmem:[#allocation2 + $0x6a0] sm:$0xff]  ;;  %v663_v57 = vld [vmem:[#allocation2 + $0x6b0] sm:$0xff] }
 0x1ca   :  { %v666_v58 = vld [vmem:[#allocation2 + $0x6c8] sm:$0xff] }
 0x1cb   :  { %743 = vmatpush1.bf16.msra.mxu0 %v605_v59  ;;  %825 = vmatpush1.bf16.msra.mxu1 %v607_v60  ;;  %v668_v59 = vld [vmem:[#allocation2 + $0x6d8] sm:$0xff]  ;;  %v665_v60 = vld [vmem:[#allocation2 + $0x6c0] sm:$0xff] }
 0x1cc   :  { %744 = vmatprep.subr.bf16.mxu0 %v610_v62  ;;  %826 = vmatprep.subr.bf16.mxu1 %v612_v63  ;;  %v667_v62 = vld [vmem:[#allocation2 + $0x6d0] sm:$0xff]  ;;  %v670_v63 = vld [vmem:[#allocation2 + $0x6e8] sm:$0xff] }
 0x1cf   :  { %745 = vmatpush1.bf16.msra.mxu0 %v609_v0  ;;  %827 = vmatpush1.bf16.msra.mxu1 %v611_v2  ;;  %v672_v0 = vld [vmem:[#allocation2 + $0x6f8] sm:$0xff]  ;;  %v669_v2 = vld [vmem:[#allocation2 + $0x6e0] sm:$0xff] }
 0x1d0   :  { %746 = vmatprep.subr.bf16.mxu0 %v614_v3  ;;  %828 = vmatprep.subr.bf16.mxu1 %v616_v7  ;;  %v671_v3 = vld [vmem:[#allocation2 + $0x6f0] sm:$0xff]  ;;  %v674_v7 = vld [vmem:[#allocation2 + $0x708] sm:$0xff] }
 0x1d3   :  { %747 = vmatpush1.bf16.msra.mxu0 %v613_v8  ;;  %829 = vmatpush1.bf16.msra.mxu1 %v615_v10  ;;  %v676_v8 = vld [vmem:[#allocation2 + $0x718] sm:$0xff]  ;;  %v673_v10 = vld [vmem:[#allocation2 + $0x700] sm:$0xff] }
 0x1d4   :  { %748 = vmatprep.subr.bf16.mxu0 %v618_v11  ;;  %830 = vmatprep.subr.bf16.mxu1 %v620_v12  ;;  %v675_v11 = vld [vmem:[#allocation2 + $0x710] sm:$0xff]  ;;  %v678_v12 = vld [vmem:[#allocation2 + $0x728] sm:$0xff] }
 0x1d7   :  { %749 = vmatpush1.bf16.msra.mxu0 %v617_v13  ;;  %831 = vmatpush1.bf16.msra.mxu1 %v619_v15  ;;  %v680_v13 = vld [vmem:[#allocation2 + $0x738] sm:$0xff]  ;;  %v677_v15 = vld [vmem:[#allocation2 + $0x720] sm:$0xff] }
 0x1d8   :  { %750 = vmatprep.subr.bf16.mxu0 %v622_v16  ;;  %832 = vmatprep.subr.bf16.mxu1 %v624_v17  ;;  %v679_v16 = vld [vmem:[#allocation2 + $0x730] sm:$0xff]  ;;  %v682_v17 = vld [vmem:[#allocation2 + $0x748] sm:$0xff] }
 0x1db   :  { %751 = vmatpush1.bf16.msra.mxu0 %v621_v19  ;;  %833 = vmatpush1.bf16.msra.mxu1 %v623_v20  ;;  %v684_v19 = vld [vmem:[#allocation2 + $0x758] sm:$0xff]  ;;  %v681_v20 = vld [vmem:[#allocation2 + $0x740] sm:$0xff] }
 0x1dc   :  { %752 = vmatprep.subr.bf16.mxu0 %v626_v21  ;;  %834 = vmatprep.subr.bf16.mxu1 %v628_v23  ;;  %v683_v21 = vld [vmem:[#allocation2 + $0x750] sm:$0xff]  ;;  %v686_v23 = vld [vmem:[#allocation2 + $0x768] sm:$0xff] }
 0x1df   :  { %753 = vmatpush1.bf16.msra.mxu0 %v625_v24  ;;  %835 = vmatpush1.bf16.msra.mxu1 %v627_v14  ;;  %v688_v24 = vld [vmem:[#allocation2 + $0x778] sm:$0xff]  ;;  %v685_v14 = vld [vmem:[#allocation2 + $0x760] sm:$0xff] }
 0x1e0   :  { %754 = vmatprep.subr.bf16.mxu0 %v630_v25  ;;  %836 = vmatprep.subr.bf16.mxu1 %v632_v4  ;;  %v687_v25 = vld [vmem:[#allocation2 + $0x770] sm:$0xff]  ;;  %v690_v4 = vld [vmem:[#allocation2 + $0x788] sm:$0xff] }
 0x1e3   :  { %755 = vmatpush1.bf16.msra.mxu0 %v629_v6  ;;  %837 = vmatpush1.bf16.msra.mxu1 %v631_v26  ;;  %v692_v6 = vld [vmem:[#allocation2 + $0x798] sm:$0xff]  ;;  %v689_v26 = vld [vmem:[#allocation2 + $0x780] sm:$0xff] }
 0x1e4   :  { %756 = vmatprep.subr.bf16.mxu0 %v634_v5  ;;  %838 = vmatprep.subr.bf16.mxu1 %v636_v27  ;;  %v691_v5 = vld [vmem:[#allocation2 + $0x790] sm:$0xff]  ;;  %v694_v27 = vld [vmem:[#allocation2 + $0x7a8] sm:$0xff] }
 0x1e7   :  { %757 = vmatpush1.bf16.msra.mxu0 %v633_v30  ;;  %839 = vmatpush1.bf16.msra.mxu1 %v635_v9  ;;  %v696_v30 = vld [vmem:[#allocation2 + $0x7b8] sm:$0xff]  ;;  %v693_v9 = vld [vmem:[#allocation2 + $0x7a0] sm:$0xff] }
 0x1e8   :  { %758 = vmatprep.subr.bf16.mxu0 %v638_v31  ;;  %840 = vmatprep.subr.bf16.mxu1 %v640_v32  ;;  %v695_v31 = vld [vmem:[#allocation2 + $0x7b0] sm:$0xff]  ;;  %v698_v32 = vld [vmem:[#allocation2 + $0x7c8] sm:$0xff] }
 0x1eb   :  { %759 = vmatpush1.bf16.msra.mxu0 %v637_v33  ;;  %841 = vmatpush1.bf16.msra.mxu1 %v639_v34  ;;  %v700_v33 = vld [vmem:[#allocation2 + $0x7d8] sm:$0xff]  ;;  %v697_v34 = vld [vmem:[#allocation2 + $0x7c0] sm:$0xff] }
 0x1ec   :  { %769 = vmatprep.subr.bf16.mxu0 %v642_v35  ;;  %851 = vmatprep.subr.bf16.mxu1 %v644_v36  ;;  %v699_v35 = vld [vmem:[#allocation2 + $0x7d0] sm:$0xff]  ;;  %v702_v36 = vld [vmem:[#allocation2 + $0x7e8] sm:$0xff] }
 0x1ee   :  { %761 = vmatmul.mubr.bf16.vlgmr.msra.gmra.mrb[8].mxu0 %v1560_v50  ;;  %843 = vmatmul.mubr.bf16.vlgmr.msra.gmra.mrb[8].mxu1 %v1560_v50  ;;  %v656_v50 = vld [vmem:[#allocation2 + $0x678] sm:$0xff] }
 0x1ef   :  { %770 = vmatpush1.bf16.msra.mxu0 %v641_v37  ;;  %852 = vmatpush1.bf16.msra.mxu1 %v643_v38  ;;  %v704_v37 = vld [vmem:[#allocation2 + $0x7f8] sm:$0xff]  ;;  %v701_v38 = vld [vmem:[#allocation2 + $0x7e0] sm:$0xff] }
 0x1f0   :  { %771 = vmatprep.subr.bf16.mxu0 %v646_v39  ;;  %853 = vmatprep.subr.bf16.mxu1 %v648_v40  ;;  %v703_v39 = vld [vmem:[#allocation2 + $0x7f0] sm:$0xff]  ;;  %v706_v40 = vld [vmem:[#allocation7 + $0x4] sm:$0xf] }
 0x1f1   :  { %801 = vmatprep.mubr.bf16.mxu0 %v1574_v29  ;;  %883 = vmatprep.mubr.bf16.mxu1 %v1574_v29  ;;  %v657_v29 = vld [vmem:[#allocation2 + $0x680] sm:$0xff] }
 0x1f3   :  { %772 = vmatpush1.bf16.msra.mxu0 %v645_v41  ;;  %854 = vmatpush1.bf16.msra.mxu1 %v647_v42  ;;  %v711_v41 = vrot.slane %v706_v40, %v1550_v18  ;;  %v719_v42 = vrot.slane %v706_v40, %v1565_v61 }
 0x1f4   :  { %773 = vmatprep.subr.bf16.mxu0 %v650_v43  ;;  %855 = vmatprep.subr.bf16.mxu1 %v652_v44  ;;  %v715_v43 = vrot.slane %v706_v40, %v1553_v22  ;;  %v723_v44 = vrot.slane %v706_v40, %v1568_v1 }
 0x1f7   :  { %774 = vmatpush1.bf16.msra.mxu0 %v649_v45  ;;  %856 = vmatpush1.bf16.msra.mxu1 %v651_v46 }
 0x1f8   :  { %775 = vmatprep.subr.bf16.mxu0 %v654_v47  ;;  %857 = vmatprep.subr.bf16.mxu1 %v656_v50 }
 0x1fb   :  { %776 = vmatpush1.bf16.msra.mxu0 %v653_v48  ;;  %858 = vmatpush1.bf16.msra.mxu1 %v655_v49 }
 0x1fc   :  { %777 = vmatprep.subr.bf16.mxu0 %v658_v51  ;;  %859 = vmatprep.subr.bf16.mxu1 %v660_v52 }
 0x1ff   :  { %778 = vmatpush1.bf16.msra.mxu0 %v657_v29  ;;  %860 = vmatpush1.bf16.msra.mxu1 %v659_v53 }
 0x200   :  { %779 = vmatprep.subr.bf16.mxu0 %v662_v54  ;;  %861 = vmatprep.subr.bf16.mxu1 %v664_v55 }
 0x203   :  { %780 = vmatpush1.bf16.msra.mxu0 %v661_v56  ;;  %862 = vmatpush1.bf16.msra.mxu1 %v663_v57 }
 0x204   :  { %781 = vmatprep.subr.bf16.mxu0 %v666_v58  ;;  %863 = vmatprep.subr.bf16.mxu1 %v668_v59 }
 0x207   :  { %782 = vmatpush1.bf16.msra.mxu0 %v665_v60  ;;  %864 = vmatpush1.bf16.msra.mxu1 %v667_v62 }
 0x208   :  { %783 = vmatprep.subr.bf16.mxu0 %v670_v63  ;;  %865 = vmatprep.subr.bf16.mxu1 %v672_v0 }
 0x20b   :  { %784 = vmatpush1.bf16.msra.mxu0 %v669_v2  ;;  %866 = vmatpush1.bf16.msra.mxu1 %v671_v3 }
 0x20c   :  { %785 = vmatprep.subr.bf16.mxu0 %v674_v7  ;;  %867 = vmatprep.subr.bf16.mxu1 %v676_v8 }
 0x20f   :  { %786 = vmatpush1.bf16.msra.mxu0 %v673_v10  ;;  %868 = vmatpush1.bf16.msra.mxu1 %v675_v11 }
 0x210   :  { %787 = vmatprep.subr.bf16.mxu0 %v678_v12  ;;  %869 = vmatprep.subr.bf16.mxu1 %v680_v13 }
 0x213   :  { %788 = vmatpush1.bf16.msra.mxu0 %v677_v15  ;;  %870 = vmatpush1.bf16.msra.mxu1 %v679_v16 }
 0x214   :  { %789 = vmatprep.subr.bf16.mxu0 %v682_v17  ;;  %871 = vmatprep.subr.bf16.mxu1 %v684_v19 }
 0x217   :  { %790 = vmatpush1.bf16.msra.mxu0 %v681_v20  ;;  %872 = vmatpush1.bf16.msra.mxu1 %v683_v21 }
 0x218   :  { %791 = vmatprep.subr.bf16.mxu0 %v686_v23  ;;  %873 = vmatprep.subr.bf16.mxu1 %v688_v24 }
 0x21b   :  { %792 = vmatpush1.bf16.msra.mxu0 %v685_v14  ;;  %874 = vmatpush1.bf16.msra.mxu1 %v687_v25 }
 0x21c   :  { %793 = vmatprep.subr.bf16.mxu0 %v690_v4  ;;  %875 = vmatprep.subr.bf16.mxu1 %v692_v6 }
 0x21f   :  { %794 = vmatpush1.bf16.msra.mxu0 %v689_v26  ;;  %876 = vmatpush1.bf16.msra.mxu1 %v691_v5 }
 0x220   :  { %795 = vmatprep.subr.bf16.mxu0 %v694_v27  ;;  %877 = vmatprep.subr.bf16.mxu1 %v696_v30 }
 0x223   :  { %796 = vmatpush1.bf16.msra.mxu0 %v693_v9  ;;  %878 = vmatpush1.bf16.msra.mxu1 %v695_v31 }
 0x224   :  { %797 = vmatprep.subr.bf16.mxu0 %v698_v32  ;;  %879 = vmatprep.subr.bf16.mxu1 %v700_v33 }
 0x227   :  { %798 = vmatpush1.bf16.msra.mxu0 %v697_v34  ;;  %880 = vmatpush1.bf16.msra.mxu1 %v699_v35 }
 0x228   :  { %799 = vmatprep.subr.bf16.mxu0 %v702_v36  ;;  %881 = vmatprep.subr.bf16.mxu1 %v704_v37 }
 0x22b   :  { %800 = vmatpush1.bf16.msra.mxu0 %v701_v38  ;;  %882 = vmatpush1.bf16.msra.mxu1 %v703_v39 }
 0x22e   :  { %802 = vmatmul.mubr.bf16.vlgmr.msra.gmra.mrb[8].mxu0 %v1572_v28  ;;  %884 = vmatmul.mubr.bf16.vlgmr.msra.gmra.mrb[8].mxu1 %v1572_v28 }
 0x301   :  { %v803_v45 = vpop.f32.mrb[8].mxu0  ;;  %v885_v46 = vpop.f32.mrb[8].mxu1 }
 0x302   :  { %v1279_v47 = vadd.f32 %v803_v45, %v711_v41  ;;  %v1281_v50 = vadd.f32 %v885_v46, %v719_v42  ;;  %v805_v48 = vpop.f32.mrb[9].mxu0  ;;  %v887_v49 = vpop.f32.mrb[9].mxu1 }
 0x303   :  { %v1280_v51 = vadd.f32 %v805_v48, %v715_v43  ;;  %v1282_v52 = vadd.f32 %v887_v49, %v723_v44  ;;  %v807_v29 = vpop.f32.mrb[10].mxu0  ;;  %v889_v53 = vpop.f32.mrb[10].mxu1 }
 0x304   :  { %v892_v28 = vmul.f32 0.01, %v1279_v47  ;;  %v894_v54 = vmul.f32 0.01, %v1281_v50  ;;  %v808_v55 = vpop.f32.mrb[11].mxu0  ;;  %v890_v56 = vpop.f32.mrb[11].mxu1 }
 0x305   :  { %v893_v57 = vmul.f32 0.01, %v1280_v51  ;;  %v895_v58 = vmul.f32 0.01, %v1282_v52 }
 0x306   :  { %v896_v59 = vmax.f32 %v1279_v47, %v892_v28  ;;  %v898_v60 = vmax.f32 %v1281_v50, %v894_v54 }
 0x307   :  { %v897_v62 = vmax.f32 %v1280_v51, %v893_v57  ;;  %v899_v63 = vmax.f32 %v1282_v52, %v895_v58 }
 0x308   :  { %v1586_v0 = vpack.c.bf16 %v896_v59, %v896_v59  ;;  %v1588_v2 = vpack.c.bf16 %v898_v60, %v898_v60 }
 0x309   :  { %v901_v3 = vpack.c.bf16 %v897_v62, %v897_v62  ;;  %v1590_v7 = vpack.c.bf16 %v899_v63, %v899_v63 }
 0x30a   :  { %1399 = dma.done.wait [#allocation3 + $0x2], 16384 }
 0x30b   :  { %1400 = vsyncadd [#allocation3 + $0x2], 4294950912  ;;  %1096 = vmatprep.mubr.bf16.mxu0 %v901_v3  ;;  %1178 = vmatprep.mubr.bf16.mxu1 %v901_v3  ;;  %v914_v8 = vld [vmem:[#allocation2 + $0x808] sm:$0xff]  ;;  %v916_v10 = vld [vmem:[#allocation2 + $0x818] sm:$0xff]  ;;  %s1423_s1 = smov [#allocation9]  }
 0x30c   :  { %v913_v11 = vld [vmem:[#allocation2 + $0x800] sm:$0xff]  ;;  %1064 = vmatprep.subr.bf16.mxu0 %v914_v8  ;;  %1146 = vmatprep.subr.bf16.mxu1 %v916_v10  ;;  %v915_v12 = vld [vmem:[#allocation2 + $0x810] sm:$0xff]  ;;  %v918_v13 = vld [vmem:[#allocation2 + $0x828] sm:$0xff]  ;;  %s1238_s2 = sshll.u32 %s1423_s1, 4  ;;  %s1239_s2 = int_to_ptr.vmem [resolvable:$true] %s1238_s2 }
 0x30d   :  { %v920_v15 = vld [vmem:[#allocation2 + $0x838] sm:$0xff]  ;;  %1065 = vmatpush1.bf16.msra.mxu0 %v913_v11  ;;  %1147 = vmatpush1.bf16.msra.mxu1 %v915_v12  ;;  %v917_v16 = vld [vmem:[#allocation2 + $0x820] sm:$0xff]  ;;  %v919_v17 = vld [vmem:[#allocation2 + $0x830] sm:$0xff]  ;;  %s1369_s23 = scalar_lea.vmem %s1239_s2, 512  ;;  %p1374_p3 = scmp.lt.s32.totalorder %s1239_s2, %s1239_s2 }
 0x30e   :  { %1066 = vmatprep.subr.bf16.mxu0 %v918_v13  ;;  %1148 = vmatprep.subr.bf16.mxu1 %v920_v15  ;;  %v922_v19 = vld [vmem:[#allocation2 + $0x848] sm:$0xff]  ;;  %v924_v20 = vld [vmem:[#allocation2 + $0x858] sm:$0xff]  ;;  %v921_v21 = vld [vmem:[#allocation2 + $0x840] sm:$0xff]  ;;  %p1370_p2 = scmp.ne.s32.totalorder %s1239_s2, %s1369_s23  ;;  %p1375_p4 = scmp.lt.s32.totalorder %s1369_s23, %s1369_s23 }
 0x30f   :  { %v923_v23 = vld [vmem:[#allocation2 + $0x850] sm:$0xff]  ;;  %v926_v24 = vld [vmem:[#allocation2 + $0x868] sm:$0xff]  ;;  %v928_v14 = vld [vmem:[#allocation2 + $0x878] sm:$0xff] }
 0x310   :  { %v925_v25 = vld [vmem:[#allocation2 + $0x860] sm:$0xff]  ;;  %v927_v4 = vld [vmem:[#allocation2 + $0x870] sm:$0xff]  ;;  %v930_v6 = vld [vmem:[#allocation2 + $0x888] sm:$0xff]  ;;  %p1376_p5 = por %p1375_p4, %p1374_p3 }
 0x311   :  { %1067 = vmatpush1.bf16.msra.mxu0 %v917_v16  ;;  %1149 = vmatpush1.bf16.msra.mxu1 %v919_v17  ;;  %v932_v26 = vld [vmem:[#allocation2 + $0x898] sm:$0xff]  ;;  %v929_v5 = vld [vmem:[#allocation2 + $0x880] sm:$0xff]  ;;  %v931_v27 = vld [vmem:[#allocation2 + $0x890] sm:$0xff] }
 0x312   :  { %1068 = vmatprep.subr.bf16.mxu0 %v922_v19  ;;  %1150 = vmatprep.subr.bf16.mxu1 %v924_v20  ;;  %v934_v30 = vld [vmem:[#allocation2 + $0x8a8] sm:$0xff]  ;;  %v936_v9 = vld [vmem:[#allocation2 + $0x8b8] sm:$0xff]  ;;  %v933_v31 = vld [vmem:[#allocation2 + $0x8a0] sm:$0xff]  ;;  %p1377_p6 = pnand %p1376_p5, %p1370_p2 }
 0x313   :  { %v935_v32 = vld [vmem:[#allocation2 + $0x8b0] sm:$0xff]  ;;  %v938_v33 = vld [vmem:[#allocation2 + $0x8c8] sm:$0xff]  ;;  %v940_v34 = vld [vmem:[#allocation2 + $0x8d8] sm:$0xff] }
 0x314   :  { %v937_v35 = vld [vmem:[#allocation2 + $0x8c0] sm:$0xff]  ;;  %v939_v36 = vld [vmem:[#allocation2 + $0x8d0] sm:$0xff]  ;;  %v942_v37 = vld [vmem:[#allocation2 + $0x8e8] sm:$0xff] }
 0x315   :  { %1069 = vmatpush1.bf16.msra.mxu0 %v921_v21  ;;  %1151 = vmatpush1.bf16.msra.mxu1 %v923_v23  ;;  %v944_v38 = vld [vmem:[#allocation2 + $0x8f8] sm:$0xff]  ;;  %v941_v39 = vld [vmem:[#allocation2 + $0x8e0] sm:$0xff]  ;;  %v943_v40 = vld [vmem:[#allocation2 + $0x8f0] sm:$0xff] }
 0x316   :  { %1070 = vmatprep.subr.bf16.mxu0 %v926_v24  ;;  %1152 = vmatprep.subr.bf16.mxu1 %v928_v14  ;;  %v946_v41 = vld [vmem:[#allocation2 + $0x908] sm:$0xff]  ;;  %v948_v42 = vld [vmem:[#allocation2 + $0x918] sm:$0xff]  ;;  %v945_v43 = vld [vmem:[#allocation2 + $0x900] sm:$0xff] }
 0x317   :  { %v947_v44 = vld [vmem:[#allocation2 + $0x910] sm:$0xff]  ;;  %v950_v45 = vld [vmem:[#allocation2 + $0x928] sm:$0xff]  ;;  %v952_v46 = vld [vmem:[#allocation2 + $0x938] sm:$0xff] }
 0x318   :  { %v949_v47 = vld [vmem:[#allocation2 + $0x920] sm:$0xff]  ;;  %v951_v50 = vld [vmem:[#allocation2 + $0x930] sm:$0xff]  ;;  %v954_v48 = vld [vmem:[#allocation2 + $0x948] sm:$0xff] }
 0x319   :  { %1071 = vmatpush1.bf16.msra.mxu0 %v925_v25  ;;  %1153 = vmatpush1.bf16.msra.mxu1 %v927_v4  ;;  %v956_v49 = vld [vmem:[#allocation2 + $0x958] sm:$0xff]  ;;  %v953_v51 = vld [vmem:[#allocation2 + $0x940] sm:$0xff]  ;;  %v955_v52 = vld [vmem:[#allocation2 + $0x950] sm:$0xff] }
 0x31a   :  { %1072 = vmatprep.subr.bf16.mxu0 %v930_v6  ;;  %1154 = vmatprep.subr.bf16.mxu1 %v932_v26  ;;  %v958_v29 = vld [vmem:[#allocation2 + $0x968] sm:$0xff]  ;;  %v960_v53 = vld [vmem:[#allocation2 + $0x978] sm:$0xff]  ;;  %v957_v28 = vld [vmem:[#allocation2 + $0x960] sm:$0xff] }
 0x31b   :  { %v959_v54 = vld [vmem:[#allocation2 + $0x970] sm:$0xff]  ;;  %v962_v55 = vld [vmem:[#allocation2 + $0x988] sm:$0xff]  ;;  %v964_v56 = vld [vmem:[#allocation2 + $0x998] sm:$0xff] }
 0x31c   :  { %v961_v57 = vld [vmem:[#allocation2 + $0x980] sm:$0xff]  ;;  %v963_v58 = vld [vmem:[#allocation2 + $0x990] sm:$0xff]  ;;  %v966_v59 = vld [vmem:[#allocation2 + $0x9a8] sm:$0xff] }
 0x31d   :  { %1073 = vmatpush1.bf16.msra.mxu0 %v929_v5  ;;  %1155 = vmatpush1.bf16.msra.mxu1 %v931_v27  ;;  %v968_v60 = vld [vmem:[#allocation2 + $0x9b8] sm:$0xff]  ;;  %v965_v62 = vld [vmem:[#allocation2 + $0x9a0] sm:$0xff]  ;;  %v967_v63 = vld [vmem:[#allocation2 + $0x9b0] sm:$0xff] }
 0x31e   :  { %1074 = vmatprep.subr.bf16.mxu0 %v934_v30  ;;  %1156 = vmatprep.subr.bf16.mxu1 %v936_v9  ;;  %v970_v3 = vld [vmem:[#allocation2 + $0x9c8] sm:$0xff]  ;;  %v972_v8 = vld [vmem:[#allocation2 + $0x9d8] sm:$0xff]  ;;  %v969_v10 = vld [vmem:[#allocation2 + $0x9c0] sm:$0xff] }
 0x31f   :  { %v971_v11 = vld [vmem:[#allocation2 + $0x9d0] sm:$0xff]  ;;  %v974_v12 = vld [vmem:[#allocation2 + $0x9e8] sm:$0xff]  ;;  %v976_v13 = vld [vmem:[#allocation2 + $0x9f8] sm:$0xff] }
 0x320   :  { %v973_v15 = vld [vmem:[#allocation2 + $0x9e0] sm:$0xff]  ;;  %v975_v16 = vld [vmem:[#allocation2 + $0x9f0] sm:$0xff]  ;;  %v978_v17 = vld [vmem:[#allocation2 + $0xa08] sm:$0xff] }
 0x321   :  { %1075 = vmatpush1.bf16.msra.mxu0 %v933_v31  ;;  %1157 = vmatpush1.bf16.msra.mxu1 %v935_v32  ;;  %v980_v19 = vld [vmem:[#allocation2 + $0xa18] sm:$0xff]  ;;  %v977_v20 = vld [vmem:[#allocation2 + $0xa00] sm:$0xff]  ;;  %v979_v21 = vld [vmem:[#allocation2 + $0xa10] sm:$0xff] }
 0x322   :  { %1076 = vmatprep.subr.bf16.mxu0 %v938_v33  ;;  %1158 = vmatprep.subr.bf16.mxu1 %v940_v34  ;;  %v982_v23 = vld [vmem:[#allocation2 + $0xa28] sm:$0xff]  ;;  %v984_v24 = vld [vmem:[#allocation2 + $0xa38] sm:$0xff]  ;;  %v981_v14 = vld [vmem:[#allocation2 + $0xa20] sm:$0xff] }
 0x323   :  { %v983_v25 = vld [vmem:[#allocation2 + $0xa30] sm:$0xff]  ;;  %v986_v4 = vld [vmem:[#allocation2 + $0xa48] sm:$0xff]  ;;  %v988_v6 = vld [vmem:[#allocation2 + $0xa58] sm:$0xff] }
 0x324   :  { %v985_v26 = vld [vmem:[#allocation2 + $0xa40] sm:$0xff]  ;;  %v987_v5 = vld [vmem:[#allocation2 + $0xa50] sm:$0xff]  ;;  %v990_v27 = vld [vmem:[#allocation2 + $0xa68] sm:$0xff] }
 0x325   :  { %1077 = vmatpush1.bf16.msra.mxu0 %v937_v35  ;;  %1159 = vmatpush1.bf16.msra.mxu1 %v939_v36  ;;  %v989_v30 = vld [vmem:[#allocation2 + $0xa60] sm:$0xff]  ;;  %v991_v9 = vld [vmem:[#allocation2 + $0xa70] sm:$0xff]  ;;  %v994_v31 = vld [vmem:[#allocation2 + $0xa88] sm:$0xff] }
 0x326   :  { %1078 = vmatprep.subr.bf16.mxu0 %v942_v37  ;;  %1160 = vmatprep.subr.bf16.mxu1 %v944_v38  ;;  %v996_v32 = vld [vmem:[#allocation2 + $0xa98] sm:$0xff]  ;;  %v995_v33 = vld [vmem:[#allocation2 + $0xa90] sm:$0xff]  ;;  %v998_v34 = vld [vmem:[#allocation2 + $0xaa8] sm:$0xff] }
 0x327   :  { %v1000_v35 = vld [vmem:[#allocation2 + $0xab8] sm:$0xff]  ;;  %v997_v36 = vld [vmem:[#allocation2 + $0xaa0] sm:$0xff]  ;;  %v999_v37 = vld [vmem:[#allocation2 + $0xab0] sm:$0xff] }
 0x328   :  { %v1002_v38 = vld [vmem:[#allocation2 + $0xac8] sm:$0xff] }
 0x329   :  { %1079 = vmatpush1.bf16.msra.mxu0 %v941_v39  ;;  %1161 = vmatpush1.bf16.msra.mxu1 %v943_v40  ;;  %v1004_v39 = vld [vmem:[#allocation2 + $0xad8] sm:$0xff]  ;;  %v1001_v40 = vld [vmem:[#allocation2 + $0xac0] sm:$0xff] }
 0x32a   :  { %1080 = vmatprep.subr.bf16.mxu0 %v946_v41  ;;  %1162 = vmatprep.subr.bf16.mxu1 %v948_v42  ;;  %v1003_v41 = vld [vmem:[#allocation2 + $0xad0] sm:$0xff]  ;;  %v1006_v42 = vld [vmem:[#allocation2 + $0xae8] sm:$0xff] }
 0x32d   :  { %1081 = vmatpush1.bf16.msra.mxu0 %v945_v43  ;;  %1163 = vmatpush1.bf16.msra.mxu1 %v947_v44  ;;  %v1008_v43 = vld [vmem:[#allocation2 + $0xaf8] sm:$0xff]  ;;  %v1005_v44 = vld [vmem:[#allocation2 + $0xae0] sm:$0xff] }
 0x32e   :  { %1082 = vmatprep.subr.bf16.mxu0 %v950_v45  ;;  %1164 = vmatprep.subr.bf16.mxu1 %v952_v46  ;;  %v1007_v45 = vld [vmem:[#allocation2 + $0xaf0] sm:$0xff]  ;;  %v1010_v46 = vld [vmem:[#allocation2 + $0xb08] sm:$0xff] }
 0x331   :  { %1083 = vmatpush1.bf16.msra.mxu0 %v949_v47  ;;  %1165 = vmatpush1.bf16.msra.mxu1 %v951_v50  ;;  %v1012_v47 = vld [vmem:[#allocation2 + $0xb18] sm:$0xff]  ;;  %v1009_v50 = vld [vmem:[#allocation2 + $0xb00] sm:$0xff] }
 0x332   :  { %1084 = vmatprep.subr.bf16.mxu0 %v954_v48  ;;  %1166 = vmatprep.subr.bf16.mxu1 %v956_v49  ;;  %v1011_v48 = vld [vmem:[#allocation2 + $0xb10] sm:$0xff]  ;;  %v1014_v49 = vld [vmem:[#allocation2 + $0xb28] sm:$0xff] }
 0x335   :  { %1085 = vmatpush1.bf16.msra.mxu0 %v953_v51  ;;  %1167 = vmatpush1.bf16.msra.mxu1 %v955_v52  ;;  %v1016_v51 = vld [vmem:[#allocation2 + $0xb38] sm:$0xff]  ;;  %v1013_v52 = vld [vmem:[#allocation2 + $0xb20] sm:$0xff] }
 0x336   :  { %1086 = vmatprep.subr.bf16.mxu0 %v958_v29  ;;  %1168 = vmatprep.subr.bf16.mxu1 %v960_v53  ;;  %v1015_v29 = vld [vmem:[#allocation2 + $0xb30] sm:$0xff]  ;;  %v1018_v53 = vld [vmem:[#allocation2 + $0xb48] sm:$0xff] }
 0x339   :  { %1087 = vmatpush1.bf16.msra.mxu0 %v957_v28  ;;  %1169 = vmatpush1.bf16.msra.mxu1 %v959_v54  ;;  %v1020_v28 = vld [vmem:[#allocation2 + $0xb58] sm:$0xff]  ;;  %v1017_v54 = vld [vmem:[#allocation2 + $0xb40] sm:$0xff] }
 0x33a   :  { %1088 = vmatprep.subr.bf16.mxu0 %v962_v55  ;;  %1170 = vmatprep.subr.bf16.mxu1 %v964_v56  ;;  %v1019_v55 = vld [vmem:[#allocation2 + $0xb50] sm:$0xff]  ;;  %v1022_v56 = vld [vmem:[#allocation2 + $0xb68] sm:$0xff] }
 0x33d   :  { %1089 = vmatpush1.bf16.msra.mxu0 %v961_v57  ;;  %1171 = vmatpush1.bf16.msra.mxu1 %v963_v58  ;;  %v1024_v57 = vld [vmem:[#allocation2 + $0xb78] sm:$0xff]  ;;  %v1021_v58 = vld [vmem:[#allocation2 + $0xb60] sm:$0xff] }
 0x33e   :  { %1090 = vmatprep.subr.bf16.mxu0 %v966_v59  ;;  %1172 = vmatprep.subr.bf16.mxu1 %v968_v60  ;;  %v1023_v59 = vld [vmem:[#allocation2 + $0xb70] sm:$0xff]  ;;  %v1026_v60 = vld [vmem:[#allocation2 + $0xb88] sm:$0xff] }
 0x341   :  { %1091 = vmatpush1.bf16.msra.mxu0 %v965_v62  ;;  %1173 = vmatpush1.bf16.msra.mxu1 %v967_v63  ;;  %v1028_v62 = vld [vmem:[#allocation2 + $0xb98] sm:$0xff]  ;;  %v1025_v63 = vld [vmem:[#allocation2 + $0xb80] sm:$0xff] }
 0x342   :  { %1092 = vmatprep.subr.bf16.mxu0 %v970_v3  ;;  %1174 = vmatprep.subr.bf16.mxu1 %v972_v8  ;;  %v1027_v3 = vld [vmem:[#allocation2 + $0xb90] sm:$0xff]  ;;  %v1030_v8 = vld [vmem:[#allocation2 + $0xba8] sm:$0xff] }
 0x345   :  { %1093 = vmatpush1.bf16.msra.mxu0 %v969_v10  ;;  %1175 = vmatpush1.bf16.msra.mxu1 %v971_v11  ;;  %v1032_v10 = vld [vmem:[#allocation2 + $0xbb8] sm:$0xff]  ;;  %v1029_v11 = vld [vmem:[#allocation2 + $0xba0] sm:$0xff] }
 0x346   :  { %1094 = vmatprep.subr.bf16.mxu0 %v974_v12  ;;  %1176 = vmatprep.subr.bf16.mxu1 %v976_v13  ;;  %v1031_v12 = vld [vmem:[#allocation2 + $0xbb0] sm:$0xff]  ;;  %v1034_v13 = vld [vmem:[#allocation2 + $0xbc8] sm:$0xff] }
 0x349   :  { %1095 = vmatpush1.bf16.msra.mxu0 %v973_v15  ;;  %1177 = vmatpush1.bf16.msra.mxu1 %v975_v16  ;;  %v1036_v15 = vld [vmem:[#allocation2 + $0xbd8] sm:$0xff]  ;;  %v1033_v16 = vld [vmem:[#allocation2 + $0xbc0] sm:$0xff] }
 0x34a   :  { %1105 = vmatprep.subr.bf16.mxu0 %v978_v17  ;;  %1187 = vmatprep.subr.bf16.mxu1 %v980_v19  ;;  %v1035_v17 = vld [vmem:[#allocation2 + $0xbd0] sm:$0xff]  ;;  %v1038_v19 = vld [vmem:[#allocation2 + $0xbe8] sm:$0xff] }
 0x34c   :  { %1097 = vmatmul.mubr.bf16.vlgmr.msra.gmra.mrb[12].mxu0 %v1586_v0  ;;  %1179 = vmatmul.mubr.bf16.vlgmr.msra.gmra.mrb[12].mxu1 %v1586_v0  ;;  %v992_v0 = vld [vmem:[#allocation2 + $0xa78] sm:$0xff] }
 0x34d   :  { %1106 = vmatpush1.bf16.msra.mxu0 %v977_v20  ;;  %1188 = vmatpush1.bf16.msra.mxu1 %v979_v21  ;;  %v1040_v20 = vld [vmem:[#allocation2 + $0xbf8] sm:$0xff]  ;;  %v1037_v21 = vld [vmem:[#allocation2 + $0xbe0] sm:$0xff] }
 0x34e   :  { %1107 = vmatprep.subr.bf16.mxu0 %v982_v23  ;;  %1189 = vmatprep.subr.bf16.mxu1 %v984_v24  ;;  %v1039_v23 = vld [vmem:[#allocation2 + $0xbf0] sm:$0xff]  ;;  %v1042_v24 = vld [vmem:[#allocation7 + $0x8] sm:$0xf] }
 0x34f   :  { %1137 = vmatprep.mubr.bf16.mxu0 %v1590_v7  ;;  %1219 = vmatprep.mubr.bf16.mxu1 %v1590_v7  ;;  %v993_v7 = vld [vmem:[#allocation2 + $0xa80] sm:$0xff] }
 0x351   :  { %1108 = vmatpush1.bf16.msra.mxu0 %v981_v14  ;;  %1190 = vmatpush1.bf16.msra.mxu1 %v983_v25  ;;  %v1047_v14 = vrot.slane %v1042_v24, %v1550_v18  ;;  %v1055_v25 = vrot.slane %v1042_v24, %v1565_v61 }
 0x352   :  { %1109 = vmatprep.subr.bf16.mxu0 %v986_v4  ;;  %1191 = vmatprep.subr.bf16.mxu1 %v988_v6  ;;  %v1051_v4 = vrot.slane %v1042_v24, %v1553_v22  ;;  %v1059_v6 = vrot.slane %v1042_v24, %v1568_v1 }
 0x355   :  { %1110 = vmatpush1.bf16.msra.mxu0 %v985_v26  ;;  %1192 = vmatpush1.bf16.msra.mxu1 %v987_v5 }
 0x356   :  { %1111 = vmatprep.subr.bf16.mxu0 %v990_v27  ;;  %1193 = vmatprep.subr.bf16.mxu1 %v992_v0 }
 0x359   :  { %1112 = vmatpush1.bf16.msra.mxu0 %v989_v30  ;;  %1194 = vmatpush1.bf16.msra.mxu1 %v991_v9 }
 0x35a   :  { %1113 = vmatprep.subr.bf16.mxu0 %v994_v31  ;;  %1195 = vmatprep.subr.bf16.mxu1 %v996_v32 }
 0x35d   :  { %1114 = vmatpush1.bf16.msra.mxu0 %v993_v7  ;;  %1196 = vmatpush1.bf16.msra.mxu1 %v995_v33 }
 0x35e   :  { %1115 = vmatprep.subr.bf16.mxu0 %v998_v34  ;;  %1197 = vmatprep.subr.bf16.mxu1 %v1000_v35 }
 0x361   :  { %1116 = vmatpush1.bf16.msra.mxu0 %v997_v36  ;;  %1198 = vmatpush1.bf16.msra.mxu1 %v999_v37 }
 0x362   :  { %1117 = vmatprep.subr.bf16.mxu0 %v1002_v38  ;;  %1199 = vmatprep.subr.bf16.mxu1 %v1004_v39 }
 0x365   :  { %1118 = vmatpush1.bf16.msra.mxu0 %v1001_v40  ;;  %1200 = vmatpush1.bf16.msra.mxu1 %v1003_v41 }
 0x366   :  { %1119 = vmatprep.subr.bf16.mxu0 %v1006_v42  ;;  %1201 = vmatprep.subr.bf16.mxu1 %v1008_v43 }
 0x369   :  { %1120 = vmatpush1.bf16.msra.mxu0 %v1005_v44  ;;  %1202 = vmatpush1.bf16.msra.mxu1 %v1007_v45 }
 0x36a   :  { %1121 = vmatprep.subr.bf16.mxu0 %v1010_v46  ;;  %1203 = vmatprep.subr.bf16.mxu1 %v1012_v47 }
 0x36d   :  { %1122 = vmatpush1.bf16.msra.mxu0 %v1009_v50  ;;  %1204 = vmatpush1.bf16.msra.mxu1 %v1011_v48 }
 0x36e   :  { %1123 = vmatprep.subr.bf16.mxu0 %v1014_v49  ;;  %1205 = vmatprep.subr.bf16.mxu1 %v1016_v51 }
 0x371   :  { %1124 = vmatpush1.bf16.msra.mxu0 %v1013_v52  ;;  %1206 = vmatpush1.bf16.msra.mxu1 %v1015_v29 }
 0x372   :  { %1125 = vmatprep.subr.bf16.mxu0 %v1018_v53  ;;  %1207 = vmatprep.subr.bf16.mxu1 %v1020_v28 }
 0x375   :  { %1126 = vmatpush1.bf16.msra.mxu0 %v1017_v54  ;;  %1208 = vmatpush1.bf16.msra.mxu1 %v1019_v55 }
 0x376   :  { %1127 = vmatprep.subr.bf16.mxu0 %v1022_v56  ;;  %1209 = vmatprep.subr.bf16.mxu1 %v1024_v57 }
 0x379   :  { %1128 = vmatpush1.bf16.msra.mxu0 %v1021_v58  ;;  %1210 = vmatpush1.bf16.msra.mxu1 %v1023_v59 }
 0x37a   :  { %1129 = vmatprep.subr.bf16.mxu0 %v1026_v60  ;;  %1211 = vmatprep.subr.bf16.mxu1 %v1028_v62 }
 0x37d   :  { %1130 = vmatpush1.bf16.msra.mxu0 %v1025_v63  ;;  %1212 = vmatpush1.bf16.msra.mxu1 %v1027_v3 }
 0x37e   :  { %1131 = vmatprep.subr.bf16.mxu0 %v1030_v8  ;;  %1213 = vmatprep.subr.bf16.mxu1 %v1032_v10 }
 0x381   :  { %1132 = vmatpush1.bf16.msra.mxu0 %v1029_v11  ;;  %1214 = vmatpush1.bf16.msra.mxu1 %v1031_v12 }
 0x382   :  { %1133 = vmatprep.subr.bf16.mxu0 %v1034_v13  ;;  %1215 = vmatprep.subr.bf16.mxu1 %v1036_v15 }
 0x385   :  { %1134 = vmatpush1.bf16.msra.mxu0 %v1033_v16  ;;  %1216 = vmatpush1.bf16.msra.mxu1 %v1035_v17 }
 0x386   :  { %1135 = vmatprep.subr.bf16.mxu0 %v1038_v19  ;;  %1217 = vmatprep.subr.bf16.mxu1 %v1040_v20 }
 0x389   :  { %1136 = vmatpush1.bf16.msra.mxu0 %v1037_v21  ;;  %1218 = vmatpush1.bf16.msra.mxu1 %v1039_v23 }
 0x38c   :  { %1138 = vmatmul.mubr.bf16.vlgmr.msra.gmra.mrb[12].mxu0 %v1588_v2  ;;  %1220 = vmatmul.mubr.bf16.vlgmr.msra.gmra.mrb[12].mxu1 %v1588_v2 }
 0x45f   :  { %v1139_v26 = vpop.f32.mrb[12].mxu0  ;;  %v1221_v5 = vpop.f32.mrb[12].mxu1 }
 0x460   :  { %v1283_v27 = vadd.f32 %v1139_v26, %v1047_v14  ;;  %v1285_v0 = vadd.f32 %v1221_v5, %v1055_v25  ;;  %v1141_v30 = vpop.f32.mrb[13].mxu0  ;;  %v1223_v9 = vpop.f32.mrb[13].mxu1 }
 0x461   :  { %v1284_v31 = vadd.f32 %v1141_v30, %v1051_v4  ;;  %v1286_v32 = vadd.f32 %v1223_v9, %v1059_v6  ;;  %v1143_v2 = vpop.f32.mrb[14].mxu0  ;;  %v1225_v7 = vpop.f32.mrb[14].mxu1 }
 0x462   :  { %1228 = vst [vmem:[#allocation9] sm:$0xff] %v1283_v27  ;;  %1230 = vst [vmem:[#allocation9 + $0x10] sm:$0xff] %v1285_v0  ;;  %v1144_v18 = vpop.f32.mrb[15].mxu0  ;;  %v1226_v61 = vpop.f32.mrb[15].mxu1 }
 0x463   :  { %1229 = vst [vmem:[#allocation9 + $0x8] sm:$0xff] %v1284_v31  ;;  %1231 = vst.msk [vmem:[#allocation9 + $0x18] sm:$0xff] %vm333_vm0, %v1286_v32 }
 0x464   :  { %1380 = shalt.err (!%p1377_p6)
}
 0x465   :  { %s1381_s25 = scalar_lea.hbm %s1620_s5, 512 }
 0x466   :  { %p1382_p7 = scmp.ne.s32.totalorder %s1620_s5, %s1381_s25  ;;  %p1385_p8 = scmp.lt.u32.totalorder %s1381_s25, %s1620_s5 }
 0x468   :  { %p1387_p9 = pnand %p1385_p8, %p1382_p7 }
 0x46a   :  { %1390 = shalt.err (!%p1387_p9)
}
 0x46b   :  { %1241 = dma.vmem_to_hbm [thread:$0]  %s1239_s2, 512, %s1620_s5, [#allocation6]  }
 0x46c   :  { %1401 = dma.done.wait [#allocation6], 512  }
 0x46d   :  { %1402 = vsyncadd [#allocation6], 4294966784 }
 0x46e   :  { %1245 = vsyncpa [#allocation5], 1 }
 0x46f   :  { %1246 = vsyncpa [#allocation8], 1 }
 0x470   :  { %1247 = vsyncpa [#allocation6], 1 }
 0x471   :  { %1248 = vsyncmov [#allocation3] }
 0x474   :  { %s1249_s7 = vpop.sfrf %1248 }
 0x475   :  { %p1276_p10 = scmp.ne.s32.totalorder %s1249_s7, 0 }
 0x477   :  { %1253 = shalt.err (%p1276_p10)  }
 0x478   :  { %1255 = vsyncmov [#allocation3 + $0x1] }
 0x47b   :  { %s1256_s8 = vpop.sfrf %1255 }
 0x47c   :  { %p1277_p11 = scmp.ne.s32.totalorder %s1256_s8, 0 }
 0x47e   :  { %1260 = shalt.err (%p1277_p11)  }
 0x47f   :  { %1262 = vsyncmov [#allocation3 + $0x2] }
 0x482   :  { %s1263_s9 = vpop.sfrf %1262 }
 0x483   :  { %p1278_p12 = scmp.ne.s32.totalorder %s1263_s9, 0 }
 0x485   :  { %1267 = shalt.err (%p1278_p12)  }

</bundles_post_ra>
